<compile_context>
chip_gen: v7x
topology: tpu7x:2x2x1
jax: 0.10.0
libtpu: 0.0.40
codegen_flags: <defaults>
</compile_context>

<pallas_src>
import functools

import jax
import jax.numpy as jnp
import numpy as np
from jax import lax
from jax.experimental import pallas as pl
from jax.experimental.pallas import tpu as pltpu

BN_EPS = 1e-5        # torch.nn.BatchNorm1d default eps
NORM_EPS = 1e-12     # F.normalize default eps
DEFAULT_TILE_E = 2048  # entity tile; ~1 MiB bf16 per buffer at Dh=128


# ----------------------------------------------------------------------------
# Fused kernel: MLP + BatchNorm/ComplEx prologue (once) + streamed scoring
# with online log-softmax / KLDiv accumulation over entity tiles.
# ----------------------------------------------------------------------------
def _fused_kernel(q_ref, w1, b1, w2, b2, w3, b3, w4, b4, w5, b5,
                  head_ref, tail_ref, tgt_ref, out_ref,
                  s_sc, m_sc, l_sc, st_sc, sabs_sc, sxlx_sc, sts_sc):
    e = pl.program_id(0)
    dh = head_ref.shape[1] // 2

    # ---- prologue: runs only on the first entity tile -----------------------
    @pl.when(e == 0)
    def _prologue():
        def lin(x, w, b):
            return jnp.dot(x, w[...], preferred_element_type=jnp.float32) + b[...]

        # applyNonLinear: lin1..lin4 (+ReLU) + hidden2rel
        x = q_ref[...]
        x = jnp.maximum(lin(x, w1, b1), 0.0)
        x = jnp.maximum(lin(x, w2, b2), 0.0)
        x = jnp.maximum(lin(x, w3, b3), 0.0)
        x = jnp.maximum(lin(x, w4, b4), 0.0)
        rel = lin(x, w5, b5)                       # (B, 2*Dh)

        head = head_ref[...]                       # (B, 2*Dh) f32

        # BatchNorm1d(2) on the stacked (B, 2, Dh) view, training mode (batch
        # statistics, gamma=1 / beta=0): one scalar mean/var per re/im channel.
        # Single-pass statistics: var = E[x^2] - m^2.
        def bn(v):
            m = jnp.mean(v)
            var = jnp.mean(v * v) - m * m
            return (v - m) * lax.rsqrt(var + BN_EPS)

        re_h = bn(head[:, :dh])
        im_h = bn(head[:, dh:])
        re_r = rel[:, :dh]
        im_r = rel[:, dh:]

        re_s = bn(re_h * re_r - im_h * im_r)       # bn2, channel 0
        im_s = bn(re_h * im_r + im_h * re_r)       # bn2, channel 1

        # Fused LHS for the single score matmul; cast to bf16 at the MXU
        # boundary only (bn / softmax math stays f32).
        s_sc[...] = jnp.concatenate([re_s, im_s], axis=1).astype(s_sc.dtype)

        # Init online-reduction accumulators.
        m_sc[...] = jnp.full(m_sc.shape, -jnp.inf, m_sc.dtype)
        l_sc[...] = jnp.zeros(l_sc.shape, l_sc.dtype)
        st_sc[...] = jnp.zeros(st_sc.shape, st_sc.dtype)
        sabs_sc[...] = jnp.zeros(sabs_sc.shape, sabs_sc.dtype)
        sxlx_sc[...] = jnp.zeros(sxlx_sc.shape, sxlx_sc.dtype)
        sts_sc[...] = jnp.zeros(sts_sc.shape, sts_sc.dtype)

    # ---- per entity tile -----------------------------------------------------
    # score = re_s @ re_t.T + im_s @ im_t.T, fused into one (B,2Dh)@(2Dh,TE)
    # matmul against the transposed bf16 tail tile.
    score = jnp.dot(s_sc[...], tail_ref[...],
                    preferred_element_type=jnp.float32)      # (B, TE) f32
    tgt = tgt_ref[...]                                        # (B, TE) f32

    # online logsumexp
    m_new = jnp.maximum(m_sc[...], jnp.max(score, axis=1, keepdims=True))
    alpha = jnp.exp(m_sc[...] - m_new)
    l_sc[...] = alpha * l_sc[...] + jnp.sum(jnp.exp(score - m_new),
                                            axis=1, keepdims=True)
    m_sc[...] = m_new

    # target-side accumulators (per row)
    st_sc[...] += jnp.sum(tgt, axis=1, keepdims=True)
    sabs_sc[...] += jnp.sum(jnp.abs(tgt), axis=1, keepdims=True)
    safe_t = jnp.where(tgt > 0.0, tgt, 1.0)
    sxlx_sc[...] += jnp.sum(jnp.where(tgt > 0.0, tgt * jnp.log(safe_t), 0.0),
                            axis=1, keepdims=True)
    sts_sc[...] += jnp.sum(tgt * score, axis=1, keepdims=True)

    # ---- epilogue: finalize KLDiv(log_softmax(score), normalize(t, p=1)) ----
    @pl.when(e == pl.num_programs(0) - 1)
    def _epilogue():
        n = jnp.maximum(sabs_sc[...], NORM_EPS)                 # L1 norms
        lse = m_sc[...] + jnp.log(l_sc[...])                    # logsumexp
        # sum_e t_n*(log t_n - logp) with t_n = t/n, logp = score - lse:
        #   = (Sxlx - St*log n - Sts + St*lse) / n   per row.
        per_row = (sxlx_sc[...] - st_sc[...] * jnp.log(n)
                   - sts_sc[...] + st_sc[...] * lse) / n
        out_ref[...] = jnp.sum(per_row, keepdims=True)          # (1, 1)


# ----------------------------------------------------------------------------
# Wrapper
# ----------------------------------------------------------------------------
@functools.partial(jax.jit, static_argnames=("tile_e",))
def relation_extractor_forward(question_embedding, p_head, p_tail, params,
                               ent_embedding, *, tile_e=DEFAULT_TILE_E):
    """Pallas implementation of RelationExtractor.forward (ComplEx, defaults)."""
    b, hid = question_embedding.shape
    e_total, emb = ent_embedding.shape
    r2 = params["w5"].shape[1]
    assert emb == r2, "entity embedding width must equal 2*relation_dim"

    tile_e = min(tile_e, e_total)
    assert tile_e % 128 == 0 and e_total % tile_e == 0, (
        "num_entities must be a multiple of the (128-aligned) entity tile")
    n_tiles = e_total // tile_e

    # nn.Embedding lookup for the heads (glue: tiny XLA gather of B rows).
    head_emb = jnp.take(ent_embedding, p_head, axis=0)          # (B, 2*Dh) f32

    # Stage the entity table transposed + bf16 for lane-dense streaming.
    # TODO(synk): in a real deployment store the table as (2*Dh, E) bf16 once
    # instead of transposing/casting per forward call.
    ent_t = ent_embedding.T.astype(jnp.bfloat16)                # (2*Dh, E)
    tgt = p_tail.astype(jnp.float32)                            # (B, E)

    const2 = lambda e: (0, 0)
    in_specs = [pl.BlockSpec((b, hid), const2)]                 # question emb
    for i in range(1, 6):
        in_specs.append(pl.BlockSpec(params[f"w{i}"].shape, const2))
        in_specs.append(pl.BlockSpec(params[f"b{i}"].shape, const2))
    in_specs += [
        pl.BlockSpec((b, emb), const2),                         # head_emb
        pl.BlockSpec((emb, tile_e), lambda e: (0, e)),          # tail tile
        pl.BlockSpec((b, tile_e), lambda e: (0, e)),            # target tile
    ]

    loss = pl.pallas_call(
        _fused_kernel,
        out_shape=jax.ShapeDtypeStruct((1, 1), jnp.float32),
        grid_spec=pltpu.PrefetchScalarGridSpec(
            num_scalar_prefetch=0,
            grid=(n_tiles,),
            in_specs=in_specs,
            out_specs=pl.BlockSpec((1, 1), const2),
            scratch_shapes=[
                pltpu.VMEM((b, r2), jnp.bfloat16),   # s = [re_s | im_s]
                pltpu.VMEM((b, 1), jnp.float32),     # running max
                pltpu.VMEM((b, 1), jnp.float32),     # running sum exp
                pltpu.VMEM((b, 1), jnp.float32),     # sum t
                pltpu.VMEM((b, 1), jnp.float32),     # sum |t|
                pltpu.VMEM((b, 1), jnp.float32),     # sum t*log t
                pltpu.VMEM((b, 1), jnp.float32),     # sum t*score
            ]),
        compiler_params=pltpu.CompilerParams(
            dimension_semantics=("arbitrary",),      # E axis is a reduction
            vmem_limit_bytes=32 * 1024 * 1024),
    )(question_embedding,
      params["w1"], params["b1"], params["w2"], params["b2"],
      params["w3"], params["b3"], params["w4"], params["b4"],
      params["w5"], params["b5"],
      head_emb, ent_t, tgt)

    return loss[0, 0]


# ----------------------------------------------------------------------------
# Pure-JAX reference (PyTorch semantics, all f32) for a sanity check
# ----------------------------------------------------------------------------
def _ref_forward(question_embedding, p_head, p_tail, params, ent_embedding):
    x = question_embedding
    for i in range(1, 5):
        x = jnp.maximum(x @ params[f"w{i}"] + params[f"b{i}"], 0.0)
    rel = x @ params["w5"] + params["b5"]

    head = ent_embedding[p_head]
    dh = head.shape[1] // 2

    def bn(v):
        m = jnp.mean(v)
        var = jnp.mean((v - m) ** 2)
        return (v - m) / jnp.sqrt(var + BN_EPS)

    re_h, im_h = bn(head[:, :dh]), bn(head[:, dh:])
    re_r, im_r = rel[:, :dh], rel[:, dh:]
    re_s = bn(re_h * re_r - im_h * im_r)
    im_s = bn(re_h * im_r + im_h * re_r)
    re_t, im_t = ent_embedding[:, :dh], ent_embedding[:, dh:]
    score = re_s @ re_t.T + im_s @ im_t.T

    logp = jax.nn.log_softmax(score, axis=1)
    tgt = p_tail.astype(jnp.float32)
    tn = tgt / jnp.maximum(jnp.sum(jnp.abs(tgt), axis=1, keepdims=True), NORM_EPS)
    kl = jnp.where(tn > 0.0,
                   tn * (jnp.log(jnp.where(tn > 0.0, tn, 1.0)) - logp), 0.0)
    return jnp.sum(kl)


# ----------------------------------------------------------------------------
# Main
# ----------------------------------------------------------------------------
if __name__ == "__main__":
    # Small shapes consistent with the module (hidden 768->128, mid 512->128,
    # relation_dim 128 -> self.relation_dim = 256, entity dim = 256).
    B = 8              # batch
    HID = 128          # roberta hidden_dim (768 in the original)
    MID = 128          # mid1..mid4 (512 in the original)
    REL_DIM = 128      # ctor relation_dim; self.relation_dim = 2*REL_DIM
    R2 = 2 * REL_DIM   # rel_embedding width
    E = 1024           # num_entities (small; real KGs use tens of thousands+)
    EMB = 2 * REL_DIM  # entity embedding width (re | im)
    TE = 256           # entity tile -> 4 grid steps exercise the online reduce

    key = jax.random.PRNGKey(0)
    keys = jax.random.split(key, 16)

    def w(k, shape, scale=0.05):
        return (scale * jax.random.normal(k, shape)).astype(jnp.float32)

    params = {
        "w1": w(keys[0], (HID, MID)), "b1": w(keys[1], (1, MID)),
        "w2": w(keys[2], (MID, MID)), "b2": w(keys[3], (1, MID)),
        "w3": w(keys[4], (MID, MID)), "b3": w(keys[5], (1, MID)),
        "w4": w(keys[6], (MID, MID)), "b4": w(keys[7], (1, MID)),
        "w5": w(keys[8], (MID, R2)),  "b5": w(keys[9], (1, R2)),
    }
    ent_embedding = w(keys[10], (E, EMB), scale=0.5)          # pretrained KGE table
    question_embedding = w(keys[11], (B, HID), scale=1.0)     # CLS embedding
    p_head = jax.random.randint(keys[12], (B,), 0, E, dtype=jnp.int32)
    tail_idx = jax.random.randint(keys[13], (B,), 0, E, dtype=jnp.int32)
    p_tail = jax.nn.one_hot(tail_idx, E, dtype=jnp.float32)   # multi-hot targets

    loss = relation_extractor_forward(question_embedding, p_head, p_tail,
                                      params, ent_embedding, tile_e=TE)
    loss = jax.block_until_ready(loss)

    loss_ref = _ref_forward(question_embedding, p_head, p_tail, params,
                            ent_embedding)
    loss_ref = jax.block_until_ready(loss_ref)

    assert np.isfinite(float(loss))
    # Kernel streams the table in bf16 (matmul operands only) -> small,
    # bounded deviation from the f32 reference.
    assert np.allclose(float(loss), float(loss_ref), rtol=3e-2, atol=0.5), (
        float(loss), float(loss_ref))
    print("KERNEL_OK")
</pallas_src>

<mosaic_0001>
module attributes {stable_mosaic.version = 11 : i64} {
  func.func @_fused_kernel(%arg0: i32, %arg1: memref<8x128xf32, #tpu.memory_space<vmem>>, %arg2: memref<128x128xf32, #tpu.memory_space<vmem>>, %arg3: memref<1x128xf32, #tpu.memory_space<vmem>>, %arg4: memref<128x128xf32, #tpu.memory_space<vmem>>, %arg5: memref<1x128xf32, #tpu.memory_space<vmem>>, %arg6: memref<128x128xf32, #tpu.memory_space<vmem>>, %arg7: memref<1x128xf32, #tpu.memory_space<vmem>>, %arg8: memref<128x128xf32, #tpu.memory_space<vmem>>, %arg9: memref<1x128xf32, #tpu.memory_space<vmem>>, %arg10: memref<128x256xf32, #tpu.memory_space<vmem>>, %arg11: memref<1x256xf32, #tpu.memory_space<vmem>>, %arg12: memref<8x256xf32, #tpu.memory_space<vmem>>, %arg13: memref<256x256xbf16, #tpu.memory_space<vmem>>, %arg14: memref<8x256xf32, #tpu.memory_space<vmem>>, %arg15: memref<1x1xf32, #tpu.memory_space<vmem>>, %arg16: memref<8x256xbf16, #tpu.memory_space<vmem>>, %arg17: memref<8x1xf32, #tpu.memory_space<vmem>>, %arg18: memref<8x1xf32, #tpu.memory_space<vmem>>, %arg19: memref<8x1xf32, #tpu.memory_space<vmem>>, %arg20: memref<8x1xf32, #tpu.memory_space<vmem>>, %arg21: memref<8x1xf32, #tpu.memory_space<vmem>>, %arg22: memref<8x1xf32, #tpu.memory_space<vmem>>) attributes {dimension_semantics = [#tpu.dimension_semantics<arbitrary>], iteration_bounds = array<i64: 4>, scalar_prefetch = 0 : i64, scratch_operands = 7 : i64, tpu.core_type = #tpu.core_type<tc>, window_params = [{pipeline_mode = #tpu.pipeline_mode<synchronous>, transform_indices = @transform_0, window_bounds = array<i64: 8, 128>}, {pipeline_mode = #tpu.pipeline_mode<synchronous>, transform_indices = @transform_1, window_bounds = array<i64: 128, 128>}, {pipeline_mode = #tpu.pipeline_mode<synchronous>, transform_indices = @transform_2, window_bounds = array<i64: 1, 128>}, {pipeline_mode = #tpu.pipeline_mode<synchronous>, transform_indices = @transform_3, window_bounds = array<i64: 128, 128>}, {pipeline_mode = #tpu.pipeline_mode<synchronous>, transform_indices = @transform_4, window_bounds = array<i64: 1, 128>}, {pipeline_mode = #tpu.pipeline_mode<synchronous>, transform_indices = @transform_5, window_bounds = array<i64: 128, 128>}, {pipeline_mode = #tpu.pipeline_mode<synchronous>, transform_indices = @transform_6, window_bounds = array<i64: 1, 128>}, {pipeline_mode = #tpu.pipeline_mode<synchronous>, transform_indices = @transform_7, window_bounds = array<i64: 128, 128>}, {pipeline_mode = #tpu.pipeline_mode<synchronous>, transform_indices = @transform_8, window_bounds = array<i64: 1, 128>}, {pipeline_mode = #tpu.pipeline_mode<synchronous>, transform_indices = @transform_9, window_bounds = array<i64: 128, 256>}, {pipeline_mode = #tpu.pipeline_mode<synchronous>, transform_indices = @transform_10, window_bounds = array<i64: 1, 256>}, {pipeline_mode = #tpu.pipeline_mode<synchronous>, transform_indices = @transform_11, window_bounds = array<i64: 8, 256>}, {transform_indices = @transform_12, window_bounds = array<i64: 256, 256>}, {transform_indices = @transform_13, window_bounds = array<i64: 8, 256>}, {pipeline_mode = #tpu.pipeline_mode<synchronous>, transform_indices = @transform_14, window_bounds = array<i64: 1, 1>}]} {
    %c0_i32 = arith.constant 0 : i32
    %0 = arith.cmpi eq, %arg0, %c0_i32 : i32
    %1 = arith.extui %0 : i1 to i32
    %c0_i32_0 = arith.constant 0 : i32
    %2 = arith.cmpi ne, %1, %c0_i32_0 : i32
    scf.if %2 {
      %c0_43 = arith.constant 0 : index
      %c0_44 = arith.constant 0 : index
      %59 = vector.load %arg1[%c0_43, %c0_44] : memref<8x128xf32, #tpu.memory_space<vmem>>, vector<8x128xf32>
      %c0_45 = arith.constant 0 : index
      %c0_46 = arith.constant 0 : index
      %60 = vector.load %arg2[%c0_45, %c0_46] : memref<128x128xf32, #tpu.memory_space<vmem>>, vector<128x128xf32>
      %cst_47 = arith.constant dense<0.000000e+00> : vector<8x128xf32>
      %61 = tpu.matmul %59, %60, %cst_47 {dimension_numbers = #tpu.dot_dimension_numbers<[1], [0], [0], [1], [0, 0, 1, 1], [], []>} : vector<8x128xf32>, vector<128x128xf32>, vector<8x128xf32> -> vector<8x128xf32>
      %c0_48 = arith.constant 0 : index
      %c0_49 = arith.constant 0 : index
      %62 = vector.load %arg3[%c0_48, %c0_49] : memref<1x128xf32, #tpu.memory_space<vmem>>, vector<1x128xf32>
      %63 = vector.broadcast %62 : vector<1x128xf32> to vector<8x128xf32>
      %64 = arith.addf %61, %63 : vector<8x128xf32>
      %cst_50 = arith.constant 0.000000e+00 : f32
      %65 = vector.broadcast %cst_50 : f32 to vector<8x128xf32>
      %66 = arith.maximumf %64, %65 : vector<8x128xf32>
      %c0_51 = arith.constant 0 : index
      %c0_52 = arith.constant 0 : index
      %67 = vector.load %arg4[%c0_51, %c0_52] : memref<128x128xf32, #tpu.memory_space<vmem>>, vector<128x128xf32>
      %cst_53 = arith.constant dense<0.000000e+00> : vector<8x128xf32>
      %68 = tpu.matmul %66, %67, %cst_53 {dimension_numbers = #tpu.dot_dimension_numbers<[1], [0], [0], [1], [0, 0, 1, 1], [], []>} : vector<8x128xf32>, vector<128x128xf32>, vector<8x128xf32> -> vector<8x128xf32>
      %c0_54 = arith.constant 0 : index
      %c0_55 = arith.constant 0 : index
      %69 = vector.load %arg5[%c0_54, %c0_55] : memref<1x128xf32, #tpu.memory_space<vmem>>, vector<1x128xf32>
      %70 = vector.broadcast %69 : vector<1x128xf32> to vector<8x128xf32>
      %71 = arith.addf %68, %70 : vector<8x128xf32>
      %cst_56 = arith.constant 0.000000e+00 : f32
      %72 = vector.broadcast %cst_56 : f32 to vector<8x128xf32>
      %73 = arith.maximumf %71, %72 : vector<8x128xf32>
      %c0_57 = arith.constant 0 : index
      %c0_58 = arith.constant 0 : index
      %74 = vector.load %arg6[%c0_57, %c0_58] : memref<128x128xf32, #tpu.memory_space<vmem>>, vector<128x128xf32>
      %cst_59 = arith.constant dense<0.000000e+00> : vector<8x128xf32>
      %75 = tpu.matmul %73, %74, %cst_59 {dimension_numbers = #tpu.dot_dimension_numbers<[1], [0], [0], [1], [0, 0, 1, 1], [], []>} : vector<8x128xf32>, vector<128x128xf32>, vector<8x128xf32> -> vector<8x128xf32>
      %c0_60 = arith.constant 0 : index
      %c0_61 = arith.constant 0 : index
      %76 = vector.load %arg7[%c0_60, %c0_61] : memref<1x128xf32, #tpu.memory_space<vmem>>, vector<1x128xf32>
      %77 = vector.broadcast %76 : vector<1x128xf32> to vector<8x128xf32>
      %78 = arith.addf %75, %77 : vector<8x128xf32>
      %cst_62 = arith.constant 0.000000e+00 : f32
      %79 = vector.broadcast %cst_62 : f32 to vector<8x128xf32>
      %80 = arith.maximumf %78, %79 : vector<8x128xf32>
      %c0_63 = arith.constant 0 : index
      %c0_64 = arith.constant 0 : index
      %81 = vector.load %arg8[%c0_63, %c0_64] : memref<128x128xf32, #tpu.memory_space<vmem>>, vector<128x128xf32>
      %cst_65 = arith.constant dense<0.000000e+00> : vector<8x128xf32>
      %82 = tpu.matmul %80, %81, %cst_65 {dimension_numbers = #tpu.dot_dimension_numbers<[1], [0], [0], [1], [0, 0, 1, 1], [], []>} : vector<8x128xf32>, vector<128x128xf32>, vector<8x128xf32> -> vector<8x128xf32>
      %c0_66 = arith.constant 0 : index
      %c0_67 = arith.constant 0 : index
      %83 = vector.load %arg9[%c0_66, %c0_67] : memref<1x128xf32, #tpu.memory_space<vmem>>, vector<1x128xf32>
      %84 = vector.broadcast %83 : vector<1x128xf32> to vector<8x128xf32>
      %85 = arith.addf %82, %84 : vector<8x128xf32>
      %cst_68 = arith.constant 0.000000e+00 : f32
      %86 = vector.broadcast %cst_68 : f32 to vector<8x128xf32>
      %87 = arith.maximumf %85, %86 : vector<8x128xf32>
      %c0_69 = arith.constant 0 : index
      %c0_70 = arith.constant 0 : index
      %88 = vector.load %arg10[%c0_69, %c0_70] : memref<128x256xf32, #tpu.memory_space<vmem>>, vector<128x256xf32>
      %cst_71 = arith.constant dense<0.000000e+00> : vector<8x256xf32>
      %89 = tpu.matmul %87, %88, %cst_71 {dimension_numbers = #tpu.dot_dimension_numbers<[1], [0], [0], [1], [0, 0, 1, 1], [], []>} : vector<8x128xf32>, vector<128x256xf32>, vector<8x256xf32> -> vector<8x256xf32>
      %c0_72 = arith.constant 0 : index
      %c0_73 = arith.constant 0 : index
      %90 = vector.load %arg11[%c0_72, %c0_73] : memref<1x256xf32, #tpu.memory_space<vmem>>, vector<1x256xf32>
      %91 = vector.broadcast %90 : vector<1x256xf32> to vector<8x256xf32>
      %92 = arith.addf %89, %91 : vector<8x256xf32>
      %c0_74 = arith.constant 0 : index
      %c0_75 = arith.constant 0 : index
      %93 = vector.load %arg12[%c0_74, %c0_75] : memref<8x256xf32, #tpu.memory_space<vmem>>, vector<8x256xf32>
      %94 = vector.extract_strided_slice %93 {offsets = [0, 0], sizes = [8, 128], strides = [1, 1]} : vector<8x256xf32> to vector<8x128xf32>
      %95 = vector.shape_cast %94 : vector<8x128xf32> to vector<1x8x128xf32>
      %cst_76 = arith.constant dense<0.000000e+00> : vector<1xf32>
      %96 = vector.multi_reduction <add>, %95, %cst_76 [1, 2] : vector<1x8x128xf32> to vector<1xf32>
      %97 = vector.shape_cast %96 : vector<1xf32> to vector<1x1x1xf32>
      %98 = vector.extract %97[0, 0, 0] : f32 from vector<1x1x1xf32>
      %cst_77 = arith.constant 1.024000e+03 : f32
      %99 = arith.divf %98, %cst_77 : f32
      %100 = arith.mulf %94, %94 : vector<8x128xf32>
      %101 = vector.shape_cast %100 : vector<8x128xf32> to vector<1x8x128xf32>
      %cst_78 = arith.constant dense<0.000000e+00> : vector<1xf32>
      %102 = vector.multi_reduction <add>, %101, %cst_78 [1, 2] : vector<1x8x128xf32> to vector<1xf32>
      %103 = vector.shape_cast %102 : vector<1xf32> to vector<1x1x1xf32>
      %104 = vector.extract %103[0, 0, 0] : f32 from vector<1x1x1xf32>
      %cst_79 = arith.constant 1.024000e+03 : f32
      %105 = arith.divf %104, %cst_79 : f32
      %106 = arith.mulf %99, %99 : f32
      %107 = arith.subf %105, %106 : f32
      %108 = vector.broadcast %99 : f32 to vector<8x128xf32>
      %109 = arith.subf %94, %108 : vector<8x128xf32>
      %cst_80 = arith.constant 9.99999974E-6 : f32
      %110 = arith.addf %107, %cst_80 : f32
      %111 = math.rsqrt %110 : f32
      %112 = vector.broadcast %111 : f32 to vector<8x128xf32>
      %113 = arith.mulf %109, %112 : vector<8x128xf32>
      %114 = vector.extract_strided_slice %93 {offsets = [0, 128], sizes = [8, 128], strides = [1, 1]} : vector<8x256xf32> to vector<8x128xf32>
      %115 = vector.shape_cast %114 : vector<8x128xf32> to vector<1x8x128xf32>
      %cst_81 = arith.constant dense<0.000000e+00> : vector<1xf32>
      %116 = vector.multi_reduction <add>, %115, %cst_81 [1, 2] : vector<1x8x128xf32> to vector<1xf32>
      %117 = vector.shape_cast %116 : vector<1xf32> to vector<1x1x1xf32>
      %118 = vector.extract %117[0, 0, 0] : f32 from vector<1x1x1xf32>
      %cst_82 = arith.constant 1.024000e+03 : f32
      %119 = arith.divf %118, %cst_82 : f32
      %120 = arith.mulf %114, %114 : vector<8x128xf32>
      %121 = vector.shape_cast %120 : vector<8x128xf32> to vector<1x8x128xf32>
      %cst_83 = arith.constant dense<0.000000e+00> : vector<1xf32>
      %122 = vector.multi_reduction <add>, %121, %cst_83 [1, 2] : vector<1x8x128xf32> to vector<1xf32>
      %123 = vector.shape_cast %122 : vector<1xf32> to vector<1x1x1xf32>
      %124 = vector.extract %123[0, 0, 0] : f32 from vector<1x1x1xf32>
      %cst_84 = arith.constant 1.024000e+03 : f32
      %125 = arith.divf %124, %cst_84 : f32
      %126 = arith.mulf %119, %119 : f32
      %127 = arith.subf %125, %126 : f32
      %128 = vector.broadcast %119 : f32 to vector<8x128xf32>
      %129 = arith.subf %114, %128 : vector<8x128xf32>
      %cst_85 = arith.constant 9.99999974E-6 : f32
      %130 = arith.addf %127, %cst_85 : f32
      %131 = math.rsqrt %130 : f32
      %132 = vector.broadcast %131 : f32 to vector<8x128xf32>
      %133 = arith.mulf %129, %132 : vector<8x128xf32>
      %134 = vector.extract_strided_slice %92 {offsets = [0, 0], sizes = [8, 128], strides = [1, 1]} : vector<8x256xf32> to vector<8x128xf32>
      %135 = vector.extract_strided_slice %92 {offsets = [0, 128], sizes = [8, 128], strides = [1, 1]} : vector<8x256xf32> to vector<8x128xf32>
      %136 = arith.mulf %113, %134 : vector<8x128xf32>
      %137 = arith.mulf %133, %135 : vector<8x128xf32>
      %138 = arith.subf %136, %137 : vector<8x128xf32>
      %139 = vector.shape_cast %138 : vector<8x128xf32> to vector<1x8x128xf32>
      %cst_86 = arith.constant dense<0.000000e+00> : vector<1xf32>
      %140 = vector.multi_reduction <add>, %139, %cst_86 [1, 2] : vector<1x8x128xf32> to vector<1xf32>
      %141 = vector.shape_cast %140 : vector<1xf32> to vector<1x1x1xf32>
      %142 = vector.extract %141[0, 0, 0] : f32 from vector<1x1x1xf32>
      %cst_87 = arith.constant 1.024000e+03 : f32
      %143 = arith.divf %142, %cst_87 : f32
      %144 = arith.mulf %138, %138 : vector<8x128xf32>
      %145 = vector.shape_cast %144 : vector<8x128xf32> to vector<1x8x128xf32>
      %cst_88 = arith.constant dense<0.000000e+00> : vector<1xf32>
      %146 = vector.multi_reduction <add>, %145, %cst_88 [1, 2] : vector<1x8x128xf32> to vector<1xf32>
      %147 = vector.shape_cast %146 : vector<1xf32> to vector<1x1x1xf32>
      %148 = vector.extract %147[0, 0, 0] : f32 from vector<1x1x1xf32>
      %cst_89 = arith.constant 1.024000e+03 : f32
      %149 = arith.divf %148, %cst_89 : f32
      %150 = arith.mulf %143, %143 : f32
      %151 = arith.subf %149, %150 : f32
      %152 = vector.broadcast %143 : f32 to vector<8x128xf32>
      %153 = arith.subf %138, %152 : vector<8x128xf32>
      %cst_90 = arith.constant 9.99999974E-6 : f32
      %154 = arith.addf %151, %cst_90 : f32
      %155 = math.rsqrt %154 : f32
      %156 = vector.broadcast %155 : f32 to vector<8x128xf32>
      %157 = arith.mulf %153, %156 : vector<8x128xf32>
      %158 = arith.mulf %113, %135 : vector<8x128xf32>
      %159 = arith.mulf %133, %134 : vector<8x128xf32>
      %160 = arith.addf %158, %159 : vector<8x128xf32>
      %161 = vector.shape_cast %160 : vector<8x128xf32> to vector<1x8x128xf32>
      %cst_91 = arith.constant dense<0.000000e+00> : vector<1xf32>
      %162 = vector.multi_reduction <add>, %161, %cst_91 [1, 2] : vector<1x8x128xf32> to vector<1xf32>
      %163 = vector.shape_cast %162 : vector<1xf32> to vector<1x1x1xf32>
      %164 = vector.extract %163[0, 0, 0] : f32 from vector<1x1x1xf32>
      %cst_92 = arith.constant 1.024000e+03 : f32
      %165 = arith.divf %164, %cst_92 : f32
      %166 = arith.mulf %160, %160 : vector<8x128xf32>
      %167 = vector.shape_cast %166 : vector<8x128xf32> to vector<1x8x128xf32>
      %cst_93 = arith.constant dense<0.000000e+00> : vector<1xf32>
      %168 = vector.multi_reduction <add>, %167, %cst_93 [1, 2] : vector<1x8x128xf32> to vector<1xf32>
      %169 = vector.shape_cast %168 : vector<1xf32> to vector<1x1x1xf32>
      %170 = vector.extract %169[0, 0, 0] : f32 from vector<1x1x1xf32>
      %cst_94 = arith.constant 1.024000e+03 : f32
      %171 = arith.divf %170, %cst_94 : f32
      %172 = arith.mulf %165, %165 : f32
      %173 = arith.subf %171, %172 : f32
      %174 = vector.broadcast %165 : f32 to vector<8x128xf32>
      %175 = arith.subf %160, %174 : vector<8x128xf32>
      %cst_95 = arith.constant 9.99999974E-6 : f32
      %176 = arith.addf %173, %cst_95 : f32
      %177 = math.rsqrt %176 : f32
      %178 = vector.broadcast %177 : f32 to vector<8x128xf32>
      %179 = arith.mulf %175, %178 : vector<8x128xf32>
      %180 = tpu.concatenate %157, %179 in 1 : vector<8x128xf32>, vector<8x128xf32> -> vector<8x256xf32>
      %181 = arith.truncf %180 : vector<8x256xf32> to vector<8x256xbf16>
      %c0_96 = arith.constant 0 : index
      %c0_97 = arith.constant 0 : index
      %182 = vector.load %arg16[%c0_96, %c0_97] : memref<8x256xbf16, #tpu.memory_space<vmem>>, vector<8x256xbf16>
      tpu.vector_store %arg16[%c0_96, %c0_97], %181 {strides = array<i32>} : memref<8x256xbf16, #tpu.memory_space<vmem>>, vector<8x256xbf16>,
      %cst_98 = arith.constant 0xFF800000 : f32
      %183 = vector.broadcast %cst_98 : f32 to vector<8x1xf32>
      %c0_99 = arith.constant 0 : index
      %c0_100 = arith.constant 0 : index
      %184 = vector.load %arg17[%c0_99, %c0_100] : memref<8x1xf32, #tpu.memory_space<vmem>>, vector<8x1xf32>
      tpu.vector_store %arg17[%c0_99, %c0_100], %183 {strides = array<i32>} : memref<8x1xf32, #tpu.memory_space<vmem>>, vector<8x1xf32>,
      %cst_101 = arith.constant 0.000000e+00 : f32
      %185 = vector.broadcast %cst_101 : f32 to vector<8x1xf32>
      %c0_102 = arith.constant 0 : index
      %c0_103 = arith.constant 0 : index
      %186 = vector.load %arg18[%c0_102, %c0_103] : memref<8x1xf32, #tpu.memory_space<vmem>>, vector<8x1xf32>
      tpu.vector_store %arg18[%c0_102, %c0_103], %185 {strides = array<i32>} : memref<8x1xf32, #tpu.memory_space<vmem>>, vector<8x1xf32>,
      %cst_104 = arith.constant 0.000000e+00 : f32
      %187 = vector.broadcast %cst_104 : f32 to vector<8x1xf32>
      %c0_105 = arith.constant 0 : index
      %c0_106 = arith.constant 0 : index
      %188 = vector.load %arg19[%c0_105, %c0_106] : memref<8x1xf32, #tpu.memory_space<vmem>>, vector<8x1xf32>
      tpu.vector_store %arg19[%c0_105, %c0_106], %187 {strides = array<i32>} : memref<8x1xf32, #tpu.memory_space<vmem>>, vector<8x1xf32>,
      %cst_107 = arith.constant 0.000000e+00 : f32
      %189 = vector.broadcast %cst_107 : f32 to vector<8x1xf32>
      %c0_108 = arith.constant 0 : index
      %c0_109 = arith.constant 0 : index
      %190 = vector.load %arg20[%c0_108, %c0_109] : memref<8x1xf32, #tpu.memory_space<vmem>>, vector<8x1xf32>
      tpu.vector_store %arg20[%c0_108, %c0_109], %189 {strides = array<i32>} : memref<8x1xf32, #tpu.memory_space<vmem>>, vector<8x1xf32>,
      %cst_110 = arith.constant 0.000000e+00 : f32
      %191 = vector.broadcast %cst_110 : f32 to vector<8x1xf32>
      %c0_111 = arith.constant 0 : index
      %c0_112 = arith.constant 0 : index
      %192 = vector.load %arg21[%c0_111, %c0_112] : memref<8x1xf32, #tpu.memory_space<vmem>>, vector<8x1xf32>
      tpu.vector_store %arg21[%c0_111, %c0_112], %191 {strides = array<i32>} : memref<8x1xf32, #tpu.memory_space<vmem>>, vector<8x1xf32>,
      %cst_113 = arith.constant 0.000000e+00 : f32
      %193 = vector.broadcast %cst_113 : f32 to vector<8x1xf32>
      %c0_114 = arith.constant 0 : index
      %c0_115 = arith.constant 0 : index
      %194 = vector.load %arg22[%c0_114, %c0_115] : memref<8x1xf32, #tpu.memory_space<vmem>>, vector<8x1xf32>
      tpu.vector_store %arg22[%c0_114, %c0_115], %193 {strides = array<i32>} : memref<8x1xf32, #tpu.memory_space<vmem>>, vector<8x1xf32>,
    } else {
    }
    %c0 = arith.constant 0 : index
    %c0_1 = arith.constant 0 : index
    %3 = vector.load %arg16[%c0, %c0_1] : memref<8x256xbf16, #tpu.memory_space<vmem>>, vector<8x256xbf16>
    %c0_2 = arith.constant 0 : index
    %c0_3 = arith.constant 0 : index
    %4 = vector.load %arg13[%c0_2, %c0_3] : memref<256x256xbf16, #tpu.memory_space<vmem>>, vector<256x256xbf16>
    %cst = arith.constant dense<0.000000e+00> : vector<8x256xf32>
    %5 = tpu.matmul %3, %4, %cst {dimension_numbers = #tpu.dot_dimension_numbers<[1], [0], [0], [1], [0, 0, 1, 1], [], []>} : vector<8x256xbf16>, vector<256x256xbf16>, vector<8x256xf32> -> vector<8x256xf32>
    %c0_4 = arith.constant 0 : index
    %c0_5 = arith.constant 0 : index
    %6 = vector.load %arg14[%c0_4, %c0_5] : memref<8x256xf32, #tpu.memory_space<vmem>>, vector<8x256xf32>
    %c0_6 = arith.constant 0 : index
    %c0_7 = arith.constant 0 : index
    %7 = vector.load %arg17[%c0_6, %c0_7] : memref<8x1xf32, #tpu.memory_space<vmem>>, vector<8x1xf32>
    %cst_8 = arith.constant dense<0xFF800000> : vector<8xf32>
    %8 = vector.multi_reduction <maximumf>, %5, %cst_8 [1] : vector<8x256xf32> to vector<8xf32>
    %9 = vector.shape_cast %8 : vector<8xf32> to vector<8x1xf32>
    %10 = arith.maximumf %7, %9 : vector<8x1xf32>
    %c0_9 = arith.constant 0 : index
    %c0_10 = arith.constant 0 : index
    %11 = vector.load %arg17[%c0_9, %c0_10] : memref<8x1xf32, #tpu.memory_space<vmem>>, vector<8x1xf32>
    %12 = arith.subf %11, %10 : vector<8x1xf32>
    %13 = math.exp %12 : vector<8x1xf32>
    %c0_11 = arith.constant 0 : index
    %c0_12 = arith.constant 0 : index
    %14 = vector.load %arg18[%c0_11, %c0_12] : memref<8x1xf32, #tpu.memory_space<vmem>>, vector<8x1xf32>
    %15 = arith.mulf %13, %14 : vector<8x1xf32>
    %16 = vector.broadcast %10 : vector<8x1xf32> to vector<8x256xf32>
    %17 = arith.subf %5, %16 : vector<8x256xf32>
    %18 = math.exp %17 : vector<8x256xf32>
    %cst_13 = arith.constant dense<0.000000e+00> : vector<8xf32>
    %19 = vector.multi_reduction <add>, %18, %cst_13 [1] : vector<8x256xf32> to vector<8xf32>
    %20 = vector.shape_cast %19 : vector<8xf32> to vector<8x1xf32>
    %21 = arith.addf %15, %20 : vector<8x1xf32>
    %c0_14 = arith.constant 0 : index
    %c0_15 = arith.constant 0 : index
    %22 = vector.load %arg18[%c0_14, %c0_15] : memref<8x1xf32, #tpu.memory_space<vmem>>, vector<8x1xf32>
    tpu.vector_store %arg18[%c0_14, %c0_15], %21 {strides = array<i32>} : memref<8x1xf32, #tpu.memory_space<vmem>>, vector<8x1xf32>,
    %c0_16 = arith.constant 0 : index
    %c0_17 = arith.constant 0 : index
    %23 = vector.load %arg17[%c0_16, %c0_17] : memref<8x1xf32, #tpu.memory_space<vmem>>, vector<8x1xf32>
    tpu.vector_store %arg17[%c0_16, %c0_17], %10 {strides = array<i32>} : memref<8x1xf32, #tpu.memory_space<vmem>>, vector<8x1xf32>,
    %c0_18 = arith.constant 0 : index
    %c0_19 = arith.constant 0 : index
    %24 = vector.load %arg19[%c0_18, %c0_19] : memref<8x1xf32, #tpu.memory_space<vmem>>, vector<8x1xf32>
    %cst_20 = arith.constant dense<0.000000e+00> : vector<8xf32>
    %25 = vector.multi_reduction <add>, %6, %cst_20 [1] : vector<8x256xf32> to vector<8xf32>
    %26 = vector.shape_cast %25 : vector<8xf32> to vector<8x1xf32>
    %27 = arith.addf %24, %26 : vector<8x1xf32>
    %c0_21 = arith.constant 0 : index
    %c0_22 = arith.constant 0 : index
    %28 = vector.load %arg19[%c0_21, %c0_22] : memref<8x1xf32, #tpu.memory_space<vmem>>, vector<8x1xf32>
    tpu.vector_store %arg19[%c0_21, %c0_22], %27 {strides = array<i32>} : memref<8x1xf32, #tpu.memory_space<vmem>>, vector<8x1xf32>,
    %c0_23 = arith.constant 0 : index
    %c0_24 = arith.constant 0 : index
    %29 = vector.load %arg20[%c0_23, %c0_24] : memref<8x1xf32, #tpu.memory_space<vmem>>, vector<8x1xf32>
    %30 = math.absf %6 : vector<8x256xf32>
    %cst_25 = arith.constant dense<0.000000e+00> : vector<8xf32>
    %31 = vector.multi_reduction <add>, %30, %cst_25 [1] : vector<8x256xf32> to vector<8xf32>
    %32 = vector.shape_cast %31 : vector<8xf32> to vector<8x1xf32>
    %33 = arith.addf %29, %32 : vector<8x1xf32>
    %c0_26 = arith.constant 0 : index
    %c0_27 = arith.constant 0 : index
    %34 = vector.load %arg20[%c0_26, %c0_27] : memref<8x1xf32, #tpu.memory_space<vmem>>, vector<8x1xf32>
    tpu.vector_store %arg20[%c0_26, %c0_27], %33 {strides = array<i32>} : memref<8x1xf32, #tpu.memory_space<vmem>>, vector<8x1xf32>,
    %cst_28 = arith.constant 0.000000e+00 : f32
    %35 = vector.broadcast %cst_28 : f32 to vector<8x256xf32>
    %36 = arith.cmpf ogt, %6, %35 : vector<8x256xf32>
    %cst_29 = arith.constant 1.000000e+00 : f32
    %37 = vector.broadcast %cst_29 : f32 to vector<8x256xf32>
    %38 = arith.select %36, %6, %37 : vector<8x256xi1>, vector<8x256xf32>
    %c0_30 = arith.constant 0 : index
    %c0_31 = arith.constant 0 : index
    %39 = vector.load %arg21[%c0_30, %c0_31] : memref<8x1xf32, #tpu.memory_space<vmem>>, vector<8x1xf32>
    %cst_32 = arith.constant 0.000000e+00 : f32
    %40 = vector.broadcast %cst_32 : f32 to vector<8x256xf32>
    %41 = arith.cmpf ogt, %6, %40 : vector<8x256xf32>
    %42 = math.log %38 : vector<8x256xf32>
    %43 = arith.mulf %6, %42 : vector<8x256xf32>
    %cst_33 = arith.constant 0.000000e+00 : f32
    %44 = vector.broadcast %cst_33 : f32 to vector<8x256xf32>
    %45 = arith.select %41, %43, %44 : vector<8x256xi1>, vector<8x256xf32>
    %cst_34 = arith.constant dense<0.000000e+00> : vector<8xf32>
    %46 = vector.multi_reduction <add>, %45, %cst_34 [1] : vector<8x256xf32> to vector<8xf32>
    %47 = vector.shape_cast %46 : vector<8xf32> to vector<8x1xf32>
    %48 = arith.addf %39, %47 : vector<8x1xf32>
    %c0_35 = arith.constant 0 : index
    %c0_36 = arith.constant 0 : index
    %49 = vector.load %arg21[%c0_35, %c0_36] : memref<8x1xf32, #tpu.memory_space<vmem>>, vector<8x1xf32>
    tpu.vector_store %arg21[%c0_35, %c0_36], %48 {strides = array<i32>} : memref<8x1xf32, #tpu.memory_space<vmem>>, vector<8x1xf32>,
    %c0_37 = arith.constant 0 : index
    %c0_38 = arith.constant 0 : index
    %50 = vector.load %arg22[%c0_37, %c0_38] : memref<8x1xf32, #tpu.memory_space<vmem>>, vector<8x1xf32>
    %51 = arith.mulf %6, %5 : vector<8x256xf32>
    %cst_39 = arith.constant dense<0.000000e+00> : vector<8xf32>
    %52 = vector.multi_reduction <add>, %51, %cst_39 [1] : vector<8x256xf32> to vector<8xf32>
    %53 = vector.shape_cast %52 : vector<8xf32> to vector<8x1xf32>
    %54 = arith.addf %50, %53 : vector<8x1xf32>
    %c0_40 = arith.constant 0 : index
    %c0_41 = arith.constant 0 : index
    %55 = vector.load %arg22[%c0_40, %c0_41] : memref<8x1xf32, #tpu.memory_space<vmem>>, vector<8x1xf32>
    tpu.vector_store %arg22[%c0_40, %c0_41], %54 {strides = array<i32>} : memref<8x1xf32, #tpu.memory_space<vmem>>, vector<8x1xf32>,
    %c3_i32 = arith.constant 3 : i32
    %56 = arith.cmpi eq, %arg0, %c3_i32 : i32
    %57 = arith.extui %56 : i1 to i32
    %c0_i32_42 = arith.constant 0 : i32
    %58 = arith.cmpi ne, %57, %c0_i32_42 : i32
    scf.if %58 {
      %c0_43 = arith.constant 0 : index
      %c0_44 = arith.constant 0 : index
      %59 = vector.load %arg20[%c0_43, %c0_44] : memref<8x1xf32, #tpu.memory_space<vmem>>, vector<8x1xf32>
      %cst_45 = arith.constant 9.99999996E-13 : f32
      %60 = vector.broadcast %cst_45 : f32 to vector<8x1xf32>
      %61 = arith.maximumf %59, %60 : vector<8x1xf32>
      %c0_46 = arith.constant 0 : index
      %c0_47 = arith.constant 0 : index
      %62 = vector.load %arg17[%c0_46, %c0_47] : memref<8x1xf32, #tpu.memory_space<vmem>>, vector<8x1xf32>
      %c0_48 = arith.constant 0 : index
      %c0_49 = arith.constant 0 : index
      %63 = vector.load %arg18[%c0_48, %c0_49] : memref<8x1xf32, #tpu.memory_space<vmem>>, vector<8x1xf32>
      %64 = math.log %63 : vector<8x1xf32>
      %65 = arith.addf %62, %64 : vector<8x1xf32>
      %c0_50 = arith.constant 0 : index
      %c0_51 = arith.constant 0 : index
      %66 = vector.load %arg21[%c0_50, %c0_51] : memref<8x1xf32, #tpu.memory_space<vmem>>, vector<8x1xf32>
      %c0_52 = arith.constant 0 : index
      %c0_53 = arith.constant 0 : index
      %67 = vector.load %arg19[%c0_52, %c0_53] : memref<8x1xf32, #tpu.memory_space<vmem>>, vector<8x1xf32>
      %68 = math.log %61 : vector<8x1xf32>
      %69 = arith.mulf %67, %68 : vector<8x1xf32>
      %70 = arith.subf %66, %69 : vector<8x1xf32>
      %c0_54 = arith.constant 0 : index
      %c0_55 = arith.constant 0 : index
      %71 = vector.load %arg22[%c0_54, %c0_55] : memref<8x1xf32, #tpu.memory_space<vmem>>, vector<8x1xf32>
      %72 = arith.subf %70, %71 : vector<8x1xf32>
      %c0_56 = arith.constant 0 : index
      %c0_57 = arith.constant 0 : index
      %73 = vector.load %arg19[%c0_56, %c0_57] : memref<8x1xf32, #tpu.memory_space<vmem>>, vector<8x1xf32>
      %74 = arith.mulf %73, %65 : vector<8x1xf32>
      %75 = arith.addf %72, %74 : vector<8x1xf32>
      %76 = arith.divf %75, %61 : vector<8x1xf32>
      %77 = vector.shape_cast %76 : vector<8x1xf32> to vector<1x8x1xf32>
      %cst_58 = arith.constant dense<0.000000e+00> : vector<1xf32>
      %78 = vector.multi_reduction <add>, %77, %cst_58 [1, 2] : vector<1x8x1xf32> to vector<1xf32>
      %79 = vector.shape_cast %78 : vector<1xf32> to vector<1x1x1xf32>
      %80 = vector.extract %79[0, 0, 0] : f32 from vector<1x1x1xf32>
      %81 = vector.broadcast %80 : f32 to vector<1x1xf32>
      %c0_59 = arith.constant 0 : index
      %c0_60 = arith.constant 0 : index
      %82 = vector.load %arg15[%c0_59, %c0_60] : memref<1x1xf32, #tpu.memory_space<vmem>>, vector<1x1xf32>
      tpu.vector_store %arg15[%c0_59, %c0_60], %81 {strides = array<i32>} : memref<1x1xf32, #tpu.memory_space<vmem>>, vector<1x1xf32>,
    } else {
    }
    return
  }
  func.func @transform_0(%arg0: i32) -> (i32, i32) {
    %c0_i32 = arith.constant 0 : i32
    %c0_i32_0 = arith.constant 0 : i32
    %c0_i32_1 = arith.constant 0 : i32
    return %c0_i32, %c0_i32_0 : i32, i32
  }
  func.func @transform_1(%arg0: i32) -> (i32, i32) {
    %c0_i32 = arith.constant 0 : i32
    %c0_i32_0 = arith.constant 0 : i32
    %c0_i32_1 = arith.constant 0 : i32
    return %c0_i32, %c0_i32_0 : i32, i32
  }
  func.func @transform_2(%arg0: i32) -> (i32, i32) {
    %c0_i32 = arith.constant 0 : i32
    %c0_i32_0 = arith.constant 0 : i32
    %c0_i32_1 = arith.constant 0 : i32
    return %c0_i32, %c0_i32_0 : i32, i32
  }
  func.func @transform_3(%arg0: i32) -> (i32, i32) {
    %c0_i32 = arith.constant 0 : i32
    %c0_i32_0 = arith.constant 0 : i32
    %c0_i32_1 = arith.constant 0 : i32
    return %c0_i32, %c0_i32_0 : i32, i32
  }
  func.func @transform_4(%arg0: i32) -> (i32, i32) {
    %c0_i32 = arith.constant 0 : i32
    %c0_i32_0 = arith.constant 0 : i32
    %c0_i32_1 = arith.constant 0 : i32
    return %c0_i32, %c0_i32_0 : i32, i32
  }
  func.func @transform_5(%arg0: i32) -> (i32, i32) {
    %c0_i32 = arith.constant 0 : i32
    %c0_i32_0 = arith.constant 0 : i32
    %c0_i32_1 = arith.constant 0 : i32
    return %c0_i32, %c0_i32_0 : i32, i32
  }
  func.func @transform_6(%arg0: i32) -> (i32, i32) {
    %c0_i32 = arith.constant 0 : i32
    %c0_i32_0 = arith.constant 0 : i32
    %c0_i32_1 = arith.constant 0 : i32
    return %c0_i32, %c0_i32_0 : i32, i32
  }
  func.func @transform_7(%arg0: i32) -> (i32, i32) {
    %c0_i32 = arith.constant 0 : i32
    %c0_i32_0 = arith.constant 0 : i32
    %c0_i32_1 = arith.constant 0 : i32
    return %c0_i32, %c0_i32_0 : i32, i32
  }
  func.func @transform_8(%arg0: i32) -> (i32, i32) {
    %c0_i32 = arith.constant 0 : i32
    %c0_i32_0 = arith.constant 0 : i32
    %c0_i32_1 = arith.constant 0 : i32
    return %c0_i32, %c0_i32_0 : i32, i32
  }
  func.func @transform_9(%arg0: i32) -> (i32, i32) {
    %c0_i32 = arith.constant 0 : i32
    %c0_i32_0 = arith.constant 0 : i32
    %c0_i32_1 = arith.constant 0 : i32
    return %c0_i32, %c0_i32_0 : i32, i32
  }
  func.func @transform_10(%arg0: i32) -> (i32, i32) {
    %c0_i32 = arith.constant 0 : i32
    %c0_i32_0 = arith.constant 0 : i32
    %c0_i32_1 = arith.constant 0 : i32
    return %c0_i32, %c0_i32_0 : i32, i32
  }
  func.func @transform_11(%arg0: i32) -> (i32, i32) {
    %c0_i32 = arith.constant 0 : i32
    %c0_i32_0 = arith.constant 0 : i32
    %c0_i32_1 = arith.constant 0 : i32
    return %c0_i32, %c0_i32_0 : i32, i32
  }
  func.func @transform_12(%arg0: i32) -> (i32, i32) {
    %c0_i32 = arith.constant 0 : i32
    %c0_i32_0 = arith.constant 0 : i32
    return %c0_i32, %arg0 : i32, i32
  }
  func.func @transform_13(%arg0: i32) -> (i32, i32) {
    %c0_i32 = arith.constant 0 : i32
    %c0_i32_0 = arith.constant 0 : i32
    return %c0_i32, %arg0 : i32, i32
  }
  func.func @transform_14(%arg0: i32) -> (i32, i32) {
    %c0_i32 = arith.constant 0 : i32
    %c0_i32_0 = arith.constant 0 : i32
    %c0_i32_1 = arith.constant 0 : i32
    return %c0_i32, %c0_i32_0 : i32, i32
  }
}

</mosaic_0001>

<bundles_post_ra>
// kernel: relation_extractor_forward.1
= control target key start
LH: loop header
LB: loop body
LE: loop exit
PB: predicated region body
PF: predicated region fallthrough
CT: control target
= control target key end

     0   :  { %s2943_s0 = inlined_call_operand.vmem [shape: f32[8,128], index: 0, kind: input, shape index: {}]   ;;  %s2944_s1 = inlined_call_operand.vmem [shape: f32[128,128], index: 1, kind: input, shape index: {}]   ;;  %s2945_s2 = inlined_call_operand.vmem [shape: f32[1,128], index: 2, kind: input, shape index: {}]   ;;  %s2946_s3 = inlined_call_operand.vmem [shape: f32[128,128], index: 3, kind: input, shape index: {}]   ;;  %s2947_s4 = inlined_call_operand.vmem [shape: f32[1,128], index: 4, kind: input, shape index: {}]   ;;  %s2948_s5 = inlined_call_operand.vmem [shape: f32[128,128], index: 5, kind: input, shape index: {}]   ;;  %s2949_s6 = inlined_call_operand.vmem [shape: f32[1,128], index: 6, kind: input, shape index: {}]   ;;  %s2950_s7 = inlined_call_operand.vmem [shape: f32[128,128], index: 7, kind: input, shape index: {}]   ;;  %s2951_s8 = inlined_call_operand.vmem [shape: f32[1,128], index: 8, kind: input, shape index: {}]   ;;  %s2952_s9 = inlined_call_operand.vmem [shape: f32[128,256], index: 9, kind: input, shape index: {}]   ;;  %s2953_s10 = inlined_call_operand.vmem [shape: f32[1,256], index: 10, kind: input, shape index: {}]   ;;  %s2954_s11 = inlined_call_operand.vmem [shape: f32[8,256], index: 11, kind: input, shape index: {}]   ;;  %s2955_s12 = inlined_call_operand.vmem [shape: bf16[256,1024], index: 12, kind: input, shape index: {}]   ;;  %s2956_s13 = inlined_call_operand.vmem [shape: f32[8,1024], index: 13, kind: input, shape index: {}]   ;;  %s2957_s14 = inlined_call_operand.hbm [shape: f32[1,1], index: 14, kind: output, shape index: {}]  }
   0x1   :  { %2958 = sst [smem:[#allocation13_spill]] %s2955_s12 }
   0x2   :  { %2959 = sst [smem:[#allocation14_spill]] %s2956_s13 }
   0x3   :  { %19 = vsyncpa [#allocation11], 0  ;;  %s2372_s29 = smov 0   ;;  %s2374_s30 = smov 0  }
   0x4   :  { %s2376_s15 = smov 0  }
   0x5 LB: > { %s2388_s16 = sadd.s32 4294967295, %s2289_s15   ;;  %s2391_s17 = sadd.s32 1, %s2289_s15   ;;  %s2289_s15 = sphi %s2376_s15, %s2964_s15   ;;  %s2285_s30 = sphi %s2374_s30, %s2963_s30   ;;  %s2281_s29 = sphi %s2372_s29, %s2962_s29  }
   0x6   : > { %s281_s18 = ssub.s32 %s2289_s15, %s2391_s17  ;;  %s284_s19 = sadd.s32 1, %s2285_s30 }
   0x7   : > { %p282_p0 = scmp.eq.s32.totalorder %s281_s18, 0  ;;  %p291_p1 = scmp.ne.s32.totalorder %s2285_s30, %s2281_s29 }
   0x8   : > { %p292_p2 = scmp.eq.s32.totalorder %s2289_s15, 0  ;;  %p1709_p4 = scmp.ge.s32.totalorder %s2289_s15, 4 }
   0x9   : > { %s2400_s20 = scalar_select %p282_p0, %s2285_s30, %s284_s19  }
   0xa   : > { %p293_p3 = por %p292_p2, %p291_p1  ;;  %400 = sbr.rel (%p1709_p4) target bundleno = 59 (0x3b), region = 64 }
  0x11   : > { %403 = sbr.rel (!%p293_p3) target bundleno = 59 (0x3b), region = 68  ;;  %s405_s21 = sand.u32 (%p293_p3), 1, %s2285_s30  }
  0x12   : > { %s1762_s22 = sshll.u32 (%p293_p3), %s2289_s15, 3  ;;  %s1710_s23 = sshll.u32 (%p293_p3), %s405_s21, 8 }
  0x13   : > { %s2960_s12 = sld [smem:[#allocation13_spill]] (%p293_p3)  ;;  %s2413_s27 = scalar_lea.vmem (%p293_p3), [#allocation9], %s1710_s23 }
  0x19   : > { %s2408_s26 = scalar_lea.vmem %s2960_s12, %s1762_s22 }
  0x1a   : > { %v500_v0 = vld [vmem:[%s2408_s26] sm:$0xff] }
  0x1b   : > { %v502_v1 = vld [vmem:[%s2408_s26 + $0x20] sm:$0xff]  ;;  %501 = vst [vmem:[%s2413_s27] sm:$0xff] %v500_v0 }
  0x1c   : > { %v504_v2 = vld [vmem:[%s2408_s26 + $0x40] sm:$0xff]  ;;  %503 = vst [vmem:[%s2413_s27 + $0x8] sm:$0xff] %v502_v1 }
  0x1d   : > { %505 = vst [vmem:[%s2413_s27 + $0x10] sm:$0xff] %v504_v2  ;;  %v506_v3 = vld [vmem:[%s2408_s26 + $0x60] sm:$0xff] }
  0x1e   : > { %v508_v4 = vld [vmem:[%s2408_s26 + $0x80] sm:$0xff]  ;;  %507 = vst [vmem:[%s2413_s27 + $0x18] sm:$0xff] %v506_v3 }
  0x1f   : > { %v510_v5 = vld [vmem:[%s2408_s26 + $0xa0] sm:$0xff]  ;;  %509 = vst [vmem:[%s2413_s27 + $0x20] sm:$0xff] %v508_v4 }
  0x20   : > { %511 = vst [vmem:[%s2413_s27 + $0x28] sm:$0xff] %v510_v5  ;;  %v512_v6 = vld [vmem:[%s2408_s26 + $0xc0] sm:$0xff] }
  0x21   : > { %v514_v7 = vld [vmem:[%s2408_s26 + $0xe0] sm:$0xff]  ;;  %513 = vst [vmem:[%s2413_s27 + $0x30] sm:$0xff] %v512_v6 }
  0x22   : > { %v516_v8 = vld [vmem:[%s2408_s26 + $0x100] sm:$0xff]  ;;  %515 = vst [vmem:[%s2413_s27 + $0x38] sm:$0xff] %v514_v7 }
  0x23   : > { %517 = vst [vmem:[%s2413_s27 + $0x40] sm:$0xff] %v516_v8  ;;  %v518_v9 = vld [vmem:[%s2408_s26 + $0x120] sm:$0xff] }
  0x24   : > { %v520_v10 = vld [vmem:[%s2408_s26 + $0x140] sm:$0xff]  ;;  %519 = vst [vmem:[%s2413_s27 + $0x48] sm:$0xff] %v518_v9 }
  0x25   : > { %v522_v11 = vld [vmem:[%s2408_s26 + $0x160] sm:$0xff]  ;;  %521 = vst [vmem:[%s2413_s27 + $0x50] sm:$0xff] %v520_v10 }
  0x26   : > { %523 = vst [vmem:[%s2413_s27 + $0x58] sm:$0xff] %v522_v11  ;;  %v524_v12 = vld [vmem:[%s2408_s26 + $0x180] sm:$0xff] }
  0x27   : > { %v526_v13 = vld [vmem:[%s2408_s26 + $0x1a0] sm:$0xff]  ;;  %525 = vst [vmem:[%s2413_s27 + $0x60] sm:$0xff] %v524_v12 }
  0x28   : > { %v528_v14 = vld [vmem:[%s2408_s26 + $0x1c0] sm:$0xff]  ;;  %527 = vst [vmem:[%s2413_s27 + $0x68] sm:$0xff] %v526_v13 }
  0x29   : > { %529 = vst [vmem:[%s2413_s27 + $0x70] sm:$0xff] %v528_v14  ;;  %v530_v15 = vld [vmem:[%s2408_s26 + $0x1e0] sm:$0xff] }
  0x2a   : > { %v532_v16 = vld [vmem:[%s2408_s26 + $0x200] sm:$0xff]  ;;  %531 = vst [vmem:[%s2413_s27 + $0x78] sm:$0xff] %v530_v15 }
  0x2b   : > { %v534_v17 = vld [vmem:[%s2408_s26 + $0x220] sm:$0xff]  ;;  %533 = vst [vmem:[%s2413_s27 + $0x80] sm:$0xff] %v532_v16 }
  0x2c   : > { %535 = vst [vmem:[%s2413_s27 + $0x88] sm:$0xff] %v534_v17  ;;  %v536_v18 = vld [vmem:[%s2408_s26 + $0x240] sm:$0xff] }
  0x2d   : > { %v538_v19 = vld [vmem:[%s2408_s26 + $0x260] sm:$0xff]  ;;  %537 = vst [vmem:[%s2413_s27 + $0x90] sm:$0xff] %v536_v18 }
  0x2e   : > { %v540_v20 = vld [vmem:[%s2408_s26 + $0x280] sm:$0xff]  ;;  %539 = vst [vmem:[%s2413_s27 + $0x98] sm:$0xff] %v538_v19 }
  0x2f   : > { %541 = vst [vmem:[%s2413_s27 + $0xa0] sm:$0xff] %v540_v20  ;;  %v542_v21 = vld [vmem:[%s2408_s26 + $0x2a0] sm:$0xff] }
  0x30   : > { %v544_v22 = vld [vmem:[%s2408_s26 + $0x2c0] sm:$0xff]  ;;  %543 = vst [vmem:[%s2413_s27 + $0xa8] sm:$0xff] %v542_v21 }
  0x31   : > { %v546_v23 = vld [vmem:[%s2408_s26 + $0x2e0] sm:$0xff]  ;;  %545 = vst [vmem:[%s2413_s27 + $0xb0] sm:$0xff] %v544_v22 }
  0x32   : > { %547 = vst [vmem:[%s2413_s27 + $0xb8] sm:$0xff] %v546_v23  ;;  %v548_v24 = vld [vmem:[%s2408_s26 + $0x300] sm:$0xff] }
  0x33   : > { %v550_v25 = vld [vmem:[%s2408_s26 + $0x320] sm:$0xff]  ;;  %549 = vst [vmem:[%s2413_s27 + $0xc0] sm:$0xff] %v548_v24 }
  0x34   : > { %v552_v26 = vld [vmem:[%s2408_s26 + $0x340] sm:$0xff]  ;;  %551 = vst [vmem:[%s2413_s27 + $0xc8] sm:$0xff] %v550_v25 }
  0x35   : > { %553 = vst [vmem:[%s2413_s27 + $0xd0] sm:$0xff] %v552_v26  ;;  %v554_v27 = vld [vmem:[%s2408_s26 + $0x360] sm:$0xff] }
  0x36   : > { %v556_v28 = vld [vmem:[%s2408_s26 + $0x380] sm:$0xff]  ;;  %555 = vst [vmem:[%s2413_s27 + $0xd8] sm:$0xff] %v554_v27 }
  0x37   : > { %v558_v29 = vld [vmem:[%s2408_s26 + $0x3a0] sm:$0xff]  ;;  %557 = vst [vmem:[%s2413_s27 + $0xe0] sm:$0xff] %v556_v28 }
  0x38   : > { %559 = vst [vmem:[%s2413_s27 + $0xe8] sm:$0xff] %v558_v29  ;;  %v560_v30 = vld [vmem:[%s2408_s26 + $0x3c0] sm:$0xff] }
  0x39   : > { %v562_v31 = vld [vmem:[%s2408_s26 + $0x3e0] sm:$0xff]  ;;  %561 = vst [vmem:[%s2413_s27 + $0xf0] sm:$0xff] %v560_v30 }
  0x3a   : > { %563 = vst [vmem:[%s2413_s27 + $0xf8] sm:$0xff] %v562_v31 }
  0x3b PF: > { %p1713_p5 = scmp.ge.s32.totalorder %s2289_s15, 1  ;;  %p577_p6 = scmp.lt.s32.totalorder %s2289_s15, 5 }
  0x3d   : > { %p578_p7 = pnand %p1713_p5, %p577_p6 }
  0x3e   : > { %s584_s28 = sand.u32 (!%p578_p7), 1, %s2281_s29   ;;  %s1715_s18 = sshll.u32 (!%p578_p7), %s2388_s16, 1 }
  0x3f   : > { %581 = sbr.rel (%p578_p7) target bundleno = 2518 (0x9d6), region = 110  ;;  %s1714_s19 = sshll.u32 (!%p578_p7), %s584_s28, 8 }
  0x40   : > { %p631_p8 = scmp.lt.s32.totalorder (!%p578_p7), %s1715_s18, 7  ;;  %s2961_s13 = sld [smem:[#allocation14_spill]] (!%p578_p7) }
  0x41   : > { %s2485_s25 = scalar_lea.vmem (!%p578_p7), [#allocation9], %s1714_s19  ;;  %p1717_p9 = scmp.ne.s32.totalorder (!%p578_p7), %s2388_s16, 0 }
  0x46   : > { %s2966_s18 = smov (!%p631_p8, %s1715_s18), 7  ;;  %639 = sbr.rel (%p1717_p9) target bundleno = 1540 (0x604), region = 118 }
  0x47   : > { %s1716_s21 = sshll.u32 %s2966_s18, 3  ;;  %v641_v32 = vld [vmem:[%s2944_s1] sm:$0xff] (!%p1717_p9)  ;;  %v642_v33 = vld [vmem:[%s2944_s1 + $0x8] sm:$0xff] (!%p1717_p9)  ;;  %v643_v34 = vld [vmem:[%s2944_s1 + $0x10] sm:$0xff] (!%p1717_p9)  ;;  %v2291_v35 = vmov (!%p1717_p9), 0.0|0.0   ;;  %vm2292_vm0 = vmmov (!%p1717_p9), 0  }
  0x48   : > { %s2483_s24 = scalar_lea.vmem %s2961_s13, %s1716_s21  ;;  %1972 = vmatprep.subr.bf16.mxu0 (!%p1717_p9), %v2291_v35  ;;  %v1973_v36 = vpack.c.bf16 (!%p1717_p9), %v642_v33, %v641_v32  ;;  %v644_v37 = vld [vmem:[%s2944_s1 + $0x18] sm:$0xff] (!%p1717_p9)  ;;  %v2293_v38 = vmov (!%p1717_p9), 0.0   ;;  %vm1289_vm1 = vcmask (!%p1717_p9), 7168   ;;  %v2294_v39 = vmov (!%p1717_p9), -inf   ;;  %1996 = vmatprep.subr.bf16.mxu1 (!%p1717_p9), %v2291_v35  ;;  %v645_v41 = vld [vmem:[%s2944_s1 + $0x20] sm:$0xff] (!%p1717_p9)  ;;  %v646_v42 = vld [vmem:[%s2944_s1 + $0x28] sm:$0xff] (!%p1717_p9) }
  0x49   : > { %1864 = vmatprep.mubr.msk.f32.mxu0 (!%p1717_p9), %vm2292_vm0, %v2293_v38  ;;  %1290 = vst.msk [vmem:[#allocation3] sm:$0xff] (!%p1717_p9), %vm1289_vm1, %v2294_v39  ;;  %1291 = vst.msk [vmem:[#allocation4] sm:$0xff] (!%p1717_p9), %vm1289_vm1, %v2293_v38  ;;  %1899 = vmatprep.mubr.msk.f32.mxu1 (!%p1717_p9), %vm2292_vm0, %v2293_v38  ;;  %v1976_v40 = vpack.c.bf16 (!%p1717_p9), %v644_v37, %v643_v34  ;;  %v735_v43 = vld [vmem:[%s2946_s3] sm:$0xff] (!%p1717_p9)  ;;  %v736_v44 = vld [vmem:[%s2946_s3 + $0x8] sm:$0xff] (!%p1717_p9)  ;;  %v1979_v47 = vpack.c.bf16 (!%p1717_p9), %v646_v42, %v645_v41 }
  0x4a   : > { %1292 = vst.msk [vmem:[#allocation5] sm:$0xff] (!%p1717_p9), %vm1289_vm1, %v2293_v38  ;;  %1293 = vst.msk [vmem:[#allocation6] sm:$0xff] (!%p1717_p9), %vm1289_vm1, %v2293_v38  ;;  %1974 = vmatpush3.bf16.msra.mxu0 (!%p1717_p9), %v1973_v36  ;;  %v737_v45 = vld [vmem:[%s2946_s3 + $0x10] sm:$0xff] (!%p1717_p9)  ;;  %v738_v46 = vld [vmem:[%s2946_s3 + $0x18] sm:$0xff] (!%p1717_p9)  ;;  %v1997_v48 = vpack.c.bf16 (!%p1717_p9), %v736_v44, %v735_v43 }
  0x4b   : > { %1294 = vst.msk [vmem:[#allocation7] sm:$0xff] (!%p1717_p9), %vm1289_vm1, %v2293_v38  ;;  %1295 = vst.msk [vmem:[#allocation8] sm:$0xff] (!%p1717_p9), %vm1289_vm1, %v2293_v38  ;;  %1975 = vmatprep.subr.bf16.mxu0 (!%p1717_p9), %v2291_v35  ;;  %v647_v49 = vld [vmem:[%s2944_s1 + $0x30] sm:$0xff] (!%p1717_p9)  ;;  %v648_v50 = vld [vmem:[%s2944_s1 + $0x38] sm:$0xff] (!%p1717_p9)  ;;  %v2000_v51 = vpack.c.bf16 (!%p1717_p9), %v738_v46, %v737_v45 }
  0x4c   : > { %1998 = vmatpush3.bf16.msra.mxu1 (!%p1717_p9), %v1997_v48  ;;  %v739_v52 = vld [vmem:[%s2946_s3 + $0x20] sm:$0xff] (!%p1717_p9)  ;;  %v740_v53 = vld [vmem:[%s2946_s3 + $0x28] sm:$0xff] (!%p1717_p9)  ;;  %v1982_v54 = vpack.c.bf16 (!%p1717_p9), %v648_v50, %v647_v49  ;;  %v741_v58 = vld [vmem:[%s2946_s3 + $0x30] sm:$0xff] (!%p1717_p9) }
  0x4d   : > { %1999 = vmatprep.subr.bf16.mxu1 %v2291_v35  ;;  %v649_v55 = vld [vmem:[%s2944_s1 + $0x40] sm:$0xff]  ;;  %v650_v56 = vld [vmem:[%s2944_s1 + $0x48] sm:$0xff]  ;;  %v2003_v57 = vpack.c.bf16 %v740_v53, %v739_v52  ;;  %v742_v59 = vld [vmem:[%s2946_s3 + $0x38] sm:$0xff] }
  0x4e   : > { %1977 = vmatpush3.bf16.msra.mxu0 %v1976_v40  ;;  %v1985_v60 = vpack.c.bf16 %v650_v56, %v649_v55  ;;  %v651_v61 = vld [vmem:[%s2944_s1 + $0x50] sm:$0xff]  ;;  %v652_v62 = vld [vmem:[%s2944_s1 + $0x58] sm:$0xff]  ;;  %v2006_v63 = vpack.c.bf16 %v742_v59, %v741_v58  ;;  %v743_v0 = vld [vmem:[%s2946_s3 + $0x40] sm:$0xff] }
  0x4f   : > { %1978 = vmatprep.subr.bf16.mxu0 %v2291_v35  ;;  %v744_v1 = vld [vmem:[%s2946_s3 + $0x48] sm:$0xff]  ;;  %v1988_v2 = vpack.c.bf16 %v652_v62, %v651_v61  ;;  %v653_v3 = vld [vmem:[%s2944_s1 + $0x60] sm:$0xff]  ;;  %v745_v6 = vld [vmem:[%s2946_s3 + $0x50] sm:$0xff] }
  0x50   : > { %2001 = vmatpush3.bf16.msra.mxu1 %v2000_v51  ;;  %v654_v4 = vld [vmem:[%s2944_s1 + $0x68] sm:$0xff]  ;;  %v2009_v5 = vpack.c.bf16 %v744_v1, %v743_v0  ;;  %v746_v7 = vld [vmem:[%s2946_s3 + $0x58] sm:$0xff]  ;;  %v655_v9 = vld [vmem:[%s2944_s1 + $0x70] sm:$0xff] }
  0x51   : > { %2002 = vmatprep.subr.bf16.mxu1 %v2291_v35  ;;  %v1991_v8 = vpack.c.bf16 %v654_v4, %v653_v3  ;;  %v656_v10 = vld [vmem:[%s2944_s1 + $0x78] sm:$0xff]  ;;  %v2012_v11 = vpack.c.bf16 %v746_v7, %v745_v6  ;;  %v747_v12 = vld [vmem:[%s2946_s3 + $0x60] sm:$0xff]  ;;  %v748_v13 = vld [vmem:[%s2946_s3 + $0x68] sm:$0xff] }
  0x52   : > { %1980 = vmatpush3.bf16.msra.mxu0 %v1979_v47  ;;  %v1994_v14 = vpack.c.bf16 %v656_v10, %v655_v9  ;;  %v2015_v15 = vpack.c.bf16 %v748_v13, %v747_v12  ;;  %v640_v16 = vld [vmem:[%s2943_s0] sm:$0xff]  ;;  %v749_v17 = vld [vmem:[%s2946_s3 + $0x70] sm:$0xff]  ;;  %v750_v18 = vld [vmem:[%s2946_s3 + $0x78] sm:$0xff] }
  0x53   : > { %1981 = vmatprep.subr.bf16.mxu0 %v2291_v35  ;;  %v2018_v19 = vpack.c.bf16 %v750_v18, %v749_v17  ;;  %v829_v20 = vld [vmem:[%s2948_s5] sm:$0xff]  ;;  %v830_v21 = vld [vmem:[%s2948_s5 + $0x8] sm:$0xff]  ;;  %v831_v22 = vld [vmem:[%s2948_s5 + $0x10] sm:$0xff] }
  0x54   : > { %2004 = vmatpush3.bf16.msra.mxu1 %v2003_v57  ;;  %v2021_v23 = vpack.c.bf16 %v830_v21, %v829_v20  ;;  %v832_v24 = vld [vmem:[%s2948_s5 + $0x18] sm:$0xff]  ;;  %v833_v26 = vld [vmem:[%s2948_s5 + $0x20] sm:$0xff]  ;;  %v834_v27 = vld [vmem:[%s2948_s5 + $0x28] sm:$0xff] }
  0x55   : > { %2005 = vmatprep.subr.bf16.mxu1 %v2291_v35  ;;  %v2024_v25 = vpack.c.bf16 %v832_v24, %v831_v22  ;;  %v2027_v28 = vpack.c.bf16 %v834_v27, %v833_v26  ;;  %v835_v29 = vld [vmem:[%s2948_s5 + $0x30] sm:$0xff]  ;;  %v836_v30 = vld [vmem:[%s2948_s5 + $0x38] sm:$0xff]  ;;  %v837_v32 = vld [vmem:[%s2948_s5 + $0x40] sm:$0xff] }
  0x56   : > { %1983 = vmatpush3.bf16.msra.mxu0 %v1982_v54  ;;  %v2030_v31 = vpack.c.bf16 %v836_v30, %v835_v29  ;;  %v838_v33 = vld [vmem:[%s2948_s5 + $0x48] sm:$0xff]  ;;  %v839_v36 = vld [vmem:[%s2948_s5 + $0x50] sm:$0xff]  ;;  %v840_v37 = vld [vmem:[%s2948_s5 + $0x58] sm:$0xff] }
  0x57   : > { %1984 = vmatprep.subr.bf16.mxu0 %v2291_v35  ;;  %v2033_v34 = vpack.c.bf16 %v838_v33, %v837_v32  ;;  %v2036_v39 = vpack.c.bf16 %v840_v37, %v839_v36  ;;  %v841_v40 = vld [vmem:[%s2948_s5 + $0x60] sm:$0xff]  ;;  %v842_v41 = vld [vmem:[%s2948_s5 + $0x68] sm:$0xff]  ;;  %v843_v48 = vld [vmem:[%s2948_s5 + $0x70] sm:$0xff] }
  0x58   : > { %2007 = vmatpush3.bf16.msra.mxu1 %v2006_v63  ;;  %v2039_v42 = vpack.c.bf16 %v842_v41, %v841_v40  ;;  %v1718_v43 = vld [vmem:[%s2945_s2] ss:$0 sm:$0xff]  ;;  %v844_v49 = vld [vmem:[%s2948_s5 + $0x78] sm:$0xff]  ;;  %v924_v52 = vld [vmem:[%s2950_s7 + $0x8] sm:$0xff] }
  0x59   : > { %2008 = vmatprep.subr.bf16.mxu1 %v2291_v35  ;;  %v2042_v50 = vpack.c.bf16 %v844_v49, %v843_v48  ;;  %v923_v51 = vld [vmem:[%s2950_s7] sm:$0xff]  ;;  %v925_v53 = vld [vmem:[%s2950_s7 + $0x10] sm:$0xff]  ;;  %v926_v55 = vld [vmem:[%s2950_s7 + $0x18] sm:$0xff] }
  0x5a   : > { %1986 = vmatpush3.bf16.msra.mxu0 %v1985_v60  ;;  %v2045_v54 = vpack.c.bf16 %v924_v52, %v923_v51  ;;  %v2048_v56 = vpack.c.bf16 %v926_v55, %v925_v53  ;;  %v927_v57 = vld [vmem:[%s2950_s7 + $0x20] sm:$0xff]  ;;  %v928_v58 = vld [vmem:[%s2950_s7 + $0x28] sm:$0xff]  ;;  %v929_v60 = vld [vmem:[%s2950_s7 + $0x30] sm:$0xff] }
  0x5b   : > { %1987 = vmatprep.subr.bf16.mxu0 %v2291_v35  ;;  %v2051_v59 = vpack.c.bf16 %v928_v58, %v927_v57  ;;  %v930_v61 = vld [vmem:[%s2950_s7 + $0x38] sm:$0xff]  ;;  %v931_v63 = vld [vmem:[%s2950_s7 + $0x40] sm:$0xff]  ;;  %v932_v0 = vld [vmem:[%s2950_s7 + $0x48] sm:$0xff] }
  0x5c   : > { %2010 = vmatpush3.bf16.msra.mxu1 %v2009_v5  ;;  %v2054_v62 = vpack.c.bf16 %v930_v61, %v929_v60  ;;  %v2057_v1 = vpack.c.bf16 %v932_v0, %v931_v63  ;;  %v934_v3 = vld [vmem:[%s2950_s7 + $0x58] sm:$0xff]  ;;  %v935_v5 = vld [vmem:[%s2950_s7 + $0x60] sm:$0xff]  ;;  %v936_v6 = vld [vmem:[%s2950_s7 + $0x68] sm:$0xff] }
  0x5d   : > { %2011 = vmatprep.subr.bf16.mxu1 %v2291_v35  ;;  %v2063_v7 = vpack.c.bf16 %v936_v6, %v935_v5  ;;  %v937_v13 = vld [vmem:[%s2950_s7 + $0x70] sm:$0xff]  ;;  %v1018_v18 = vld [vmem:[%s2952_s9 + $0x8] sm:$0xff]  ;;  %v1017_v20 = vld [vmem:[%s2952_s9] sm:$0xff] }
  0x5e   : > { %1989 = vmatpush3.bf16.msra.mxu0 %v1988_v2  ;;  %v933_v2 = vld [vmem:[%s2950_s7 + $0x50] sm:$0xff]  ;;  %v1024_v24 = vld [vmem:[%s2952_s9 + $0x38] sm:$0xff]  ;;  %v1021_v27 = vld [vmem:[%s2952_s9 + $0x20] sm:$0xff] }
  0x5f   : > { %1990 = vmatprep.subr.bf16.mxu0 %v2291_v35  ;;  %v2060_v4 = vpack.c.bf16 %v934_v3, %v933_v2  ;;  %v1019_v22 = vld [vmem:[%s2952_s9 + $0x10] sm:$0xff]  ;;  %v1026_v29 = vld [vmem:[%s2952_s9 + $0x48] sm:$0xff]  ;;  %v1028_v30 = vld [vmem:[%s2952_s9 + $0x58] sm:$0xff] }
  0x60   : > { %2013 = vmatpush3.bf16.msra.mxu1 %v2012_v11  ;;  %v2076_v32 = vpack.c.bf16 %v1028_v30, %v1026_v29  ;;  %v1025_v33 = vld [vmem:[%s2952_s9 + $0x40] sm:$0xff]  ;;  %v1030_v36 = vld [vmem:[%s2952_s9 + $0x68] sm:$0xff]  ;;  %v1032_v37 = vld [vmem:[%s2952_s9 + $0x78] sm:$0xff] }
  0x61   : > { %2014 = vmatprep.subr.bf16.mxu1 %v2291_v35  ;;  %v2080_v40 = vpack.c.bf16 %v1032_v37, %v1030_v36  ;;  %v1029_v41 = vld [vmem:[%s2952_s9 + $0x60] sm:$0xff]  ;;  %v1035_v48 = vld [vmem:[%s2952_s9 + $0x90] sm:$0xff]  ;;  %v1038_v49 = vld [vmem:[%s2952_s9 + $0xa8] sm:$0xff] }
  0x62   : > { %1992 = vmatpush3.bf16.msra.mxu0 %v1991_v8  ;;  %v1719_v8 = vld [vmem:[%s2947_s4] ss:$0 sm:$0xff]  ;;  %v1042_v55 = vld [vmem:[%s2952_s9 + $0xc8] sm:$0xff]  ;;  %v1043_v60 = vld [vmem:[%s2952_s9 + $0xd0] sm:$0xff] }
  0x63   : > { %1993 = vmatprep.subr.bf16.mxu0 %v2291_v35  ;;  %v1037_v53 = vld [vmem:[%s2952_s9 + $0xa0] sm:$0xff] }
  0x64   : > { %2016 = vmatpush3.bf16.msra.mxu1 %v2015_v15  ;;  %v2738_v15 = vld [vmem:[%s2954_s11] sm:$0xff] }
  0x65   : > { %2017 = vmatprep.subr.bf16.mxu1 %v2291_v35  ;;  %1134 = vadd.xlane.f32.xlu0 %v2738_v15 }
  0x66   : > { %1995 = vmatpush3.bf16.msra.mxu0 %v1994_v14  ;;  %v938_v14 = vld [vmem:[%s2950_s7 + $0x78] sm:$0xff] }
  0x67   : > { %2020 = vmatprep.subr.bf16.mxu0 %v2291_v35 }
  0x68   : > { %2019 = vmatpush3.bf16.msra.mxu1 %v2018_v19  ;;  %v1020_v19 = vld [vmem:[%s2952_s9 + $0x18] sm:$0xff] }
  0x69   : > { %1865 = vmatmul.mubr.f32.vlgmr.msra.gmra.mrb[0].mxu0 %v640_v16  ;;  %2044 = vmatprep.subr.bf16.mxu1 %v2291_v35  ;;  %v2743_v16 = vld [vmem:[%s2954_s11 + $0x8] sm:$0xff]  ;;  %v2068_v21 = vpack.c.bf16 %v1020_v19, %v1018_v18  ;;  %v1048_v18 = vld [vmem:[%s2952_s9 + $0xf8] sm:$0xff] }
  0x6a   : > { %1934 = vmatprep.mubr.msk.f32.mxu0 %vm2292_vm0, %v2293_v38  ;;  %2022 = vmatpush3.bf16.msra.mxu0 %v2021_v23  ;;  %v1181_v17 = vmul.f32 %v2743_v16, %v2743_v16  ;;  %v1022_v23 = vld [vmem:[%s2952_s9 + $0x28] sm:$0xff] }
  0x6b   : > { %2023 = vmatprep.subr.bf16.mxu0 %v2291_v35  ;;  %1169 = vadd.xlane.f32.xlu1 %v2743_v16  ;;  %v2072_v26 = vpack.c.bf16 %v1024_v24, %v1022_v23 }
  0x6e   : > { %2025 = vmatpush3.bf16.msra.mxu0 %v2024_v25  ;;  %v2070_v25 = vpack.c.bf16 %v1019_v22, %v1017_v20  ;;  %v1045_v20 = vld [vmem:[%s2952_s9 + $0xe0] sm:$0xff] }
  0x6f   : > { %2026 = vmatprep.subr.bf16.mxu0 %v2291_v35  ;;  %1182 = vadd.xlane.f32.xlu1 %v1181_v17  ;;  %v1046_v17 = vld [vmem:[%s2952_s9 + $0xe8] sm:$0xff] }
  0x70   : > { %v2096_v19 = vpack.c.bf16 %v1048_v18, %v1046_v17 }
  0x72   : > { %2028 = vmatpush3.bf16.msra.mxu0 %v2027_v28  ;;  %v1023_v28 = vld [vmem:[%s2952_s9 + $0x30] sm:$0xff] }
  0x73   : > { %2029 = vmatprep.subr.bf16.mxu0 %v2291_v35 }
  0x76   : > { %2031 = vmatpush3.bf16.msra.mxu0 %v2030_v31  ;;  %v2074_v31 = vpack.c.bf16 %v1023_v28, %v1021_v27 }
  0x77   : > { %2032 = vmatprep.subr.bf16.mxu0 %v2291_v35 }
  0x7a   : > { %2034 = vmatpush3.bf16.msra.mxu0 %v2033_v34  ;;  %v1027_v34 = vld [vmem:[%s2952_s9 + $0x50] sm:$0xff] }
  0x7b   : > { %2035 = vmatprep.subr.bf16.mxu0 %v2291_v35 }
  0x7e   : > { %2037 = vmatpush3.bf16.msra.mxu0 %v2036_v39  ;;  %v2078_v39 = vpack.c.bf16 %v1027_v34, %v1025_v33 }
  0x7f   : > { %2038 = vmatprep.subr.bf16.mxu0 %v2291_v35 }
  0x82   : > { %2040 = vmatpush3.bf16.msra.mxu0 %v2039_v42  ;;  %v1031_v42 = vld [vmem:[%s2952_s9 + $0x70] sm:$0xff] }
  0x83   : > { %2041 = vmatprep.subr.bf16.mxu0 %v2291_v35 }
  0x86   : > { %2043 = vmatpush3.bf16.msra.mxu0 %v2042_v50  ;;  %v1040_v50 = vld [vmem:[%s2952_s9 + $0xb8] sm:$0xff] }
  0x87   : > { %2069 = vmatprep.subr.bf16.mxu0 %v2068_v21  ;;  %v2088_v52 = vpack.c.bf16 %v1040_v50, %v1038_v49  ;;  %v1047_v21 = vld [vmem:[%s2952_s9 + $0xf0] sm:$0xff] }
  0x88   : > { %v2098_v22 = vpack.c.bf16 %v1047_v21, %v1045_v20 }
  0xf2   : > { %v1135_v3 = vpop.xlane.xlu0 %1134 }
  0xf8   : > { %v1170_v23 = vpop.xlane.xlu1 %1169 }
  0xf9   : > { %v1171_v24 = vrot.slane %v1170_v23, 4 }
 0x13c   : > { %v730_v44 = vpop.f32.mrb[0].mxu0 }
 0x13d   : > { %v731_v45 = vadd.f32 %v1718_v43, %v730_v44  ;;  %v1866_v46 = vpop.f32.mrb[1].mxu0  ;;  %v1034_v43 = vld [vmem:[%s2952_s9 + $0x88] sm:$0xff]  ;;  %v1036_v44 = vld [vmem:[%s2952_s9 + $0x98] sm:$0xff] }
 0x13e   : > { %v2084_v46 = vpack.c.bf16 %v1036_v44, %v1034_v43 }
 0x13f   : > { %v734_v47 = vmax.f32 %v731_v45, 0.0  ;;  %v2082_v45 = vpack.c.bf16 %v1031_v42, %v1029_v41 }
 0x141   : > { %1900 = vmatmul.mubr.f32.vlgmr.msra.gmra.mrb[0].mxu1 %v734_v47  ;;  %v1033_v47 = vld [vmem:[%s2952_s9 + $0x80] sm:$0xff] }
 0x142   : > { %1969 = vmatprep.mubr.msk.f32.mxu1 %vm2292_vm0, %v2293_v38  ;;  %2046 = vmatpush3.bf16.msra.mxu1 %v2045_v54  ;;  %v2086_v51 = vpack.c.bf16 %v1035_v48, %v1033_v47  ;;  %v1039_v54 = vld [vmem:[%s2952_s9 + $0xb0] sm:$0xff]  ;;  %v1721_v47 = vld [vmem:[%s2951_s8] ss:$0 sm:$0xff] }
 0x143   : > { %2047 = vmatprep.subr.bf16.mxu1 %v2291_v35  ;;  %v2090_v57 = vpack.c.bf16 %v1039_v54, %v1037_v53 }
 0x146   : > { %2049 = vmatpush3.bf16.msra.mxu1 %v2048_v56  ;;  %v1044_v56 = vld [vmem:[%s2952_s9 + $0xd8] sm:$0xff] }
 0x147   : > { %2050 = vmatprep.subr.bf16.mxu1 %v2291_v35  ;;  %v2092_v58 = vpack.c.bf16 %v1044_v56, %v1042_v55  ;;  %v1049_v55 = vld [vmem:[%s2953_s10] sm:$0x3] }
 0x14a   : > { %2052 = vmatpush3.bf16.msra.mxu1 %v2051_v59  ;;  %v1041_v59 = vld [vmem:[%s2952_s9 + $0xc0] sm:$0xff] }
 0x14b   : > { %2053 = vmatprep.subr.bf16.mxu1 %v2291_v35  ;;  %v2094_v61 = vpack.c.bf16 %v1043_v60, %v1041_v59 }
 0x14e   : > { %2055 = vmatpush3.bf16.msra.mxu1 %v2054_v62  ;;  %v1720_v62 = vld [vmem:[%s2949_s6] ss:$0 sm:$0xff] }
 0x14f   : > { %2056 = vmatprep.subr.bf16.mxu1 %v2291_v35 }
 0x152   : > { %2058 = vmatpush3.bf16.msra.mxu1 %v2057_v1 }
 0x153   : > { %2059 = vmatprep.subr.bf16.mxu1 %v2291_v35 }
 0x156   : > { %2061 = vmatpush3.bf16.msra.mxu1 %v2060_v4  ;;  %v1136_v4 = vrot.slane %v1135_v3, 4 }
 0x157   : > { %2062 = vmatprep.subr.bf16.mxu1 %v2291_v35 }
 0x158   : > { %v1137_v5 = vadd.f32 %v1136_v4, %v1135_v3 }
 0x15a   : > { %2064 = vmatpush3.bf16.msra.mxu1 %v2063_v7  ;;  %v1138_v7 = vrot.slane %v1137_v5, 2 }
 0x15b   : > { %2065 = vmatprep.subr.bf16.mxu1 %v2291_v35  ;;  %v2066_v35 = vpack.c.bf16 %v938_v14, %v937_v13 }
 0x15e   : > { %2067 = vmatpush3.bf16.msra.mxu1 %v2066_v35 }
 0x214   : > { %v824_v9 = vpop.f32.mrb[0].mxu1 }
 0x215   : > { %v825_v10 = vadd.f32 %v1719_v8, %v824_v9  ;;  %v1901_v11 = vpop.f32.mrb[1].mxu1 }
 0x217   : > { %v828_v12 = vmax.f32 %v825_v10, 0.0  ;;  %v1139_v10 = vadd.f32 %v1138_v7, %v1137_v5 }
 0x219   : > { %1935 = vmatmul.mubr.f32.vlgmr.msra.gmra.mrb[2].mxu0 %v828_v12  ;;  %v1140_v12 = vrot.slane %v1139_v10, 1 }
 0x21a   : > { %1125 = vmatprep.mubr.f32.mxu0 %v2293_v38  ;;  %v1146_v38 = vmul.f32 %v2738_v15, %v2738_v15  ;;  %2071 = vmatpush1.bf16.msra.mxu0 %v2070_v25  ;;  %v1172_v25 = vadd.f32 %v1171_v24, %v1170_v23 }
 0x21b   : > { %2073 = vmatprep.subr.bf16.mxu0 %v2072_v26  ;;  %v1141_v13 = vadd.f32 %v1140_v12, %v1139_v10  ;;  %v1183_v26 = vpop.xlane.xlu1 %1182 }
 0x21c   : > { %1147 = vadd.xlane.f32.xlu0 %v1146_v38  ;;  %v1173_v27 = vrot.slane %v1172_v25, 2  ;;  %v1184_v28 = vrot.slane %v1183_v26, 4 }
 0x21d   : > { %2100 = vpush %v1141_v13 }
 0x21e   : > { %2075 = vmatpush1.bf16.msra.mxu0 %v2074_v31  ;;  %v1185_v30 = vadd.f32 %v1184_v28, %v1183_v26  ;;  %v1174_v31 = vadd.f32 %v1173_v27, %v1172_v25 }
 0x21f   : > { %2077 = vmatprep.subr.bf16.mxu0 %v2076_v32 }
 0x220   : > { %v1186_v32 = vrot.slane %v1185_v30, 2  ;;  %v1175_v33 = vrot.slane %v1174_v31, 1 }
 0x222   : > { %2079 = vmatpush1.bf16.msra.mxu0 %v2078_v39  ;;  %v1187_v34 = vadd.f32 %v1186_v32, %v1185_v30  ;;  %v1176_v37 = vadd.f32 %v1175_v33, %v1174_v31 }
 0x223   : > { %2081 = vmatprep.subr.bf16.mxu0 %v2080_v40 }
 0x224   : > { %v1188_v36 = vrot.slane %v1187_v34, 1 }
 0x226   : > { %2083 = vmatpush1.bf16.msra.mxu0 %v2082_v45  ;;  %v1189_v39 = vadd.f32 %v1188_v36, %v1187_v34 }
 0x227   : > { %2085 = vmatprep.subr.bf16.mxu0 %v2084_v46 }
 0x22a   : > { %2087 = vmatpush1.bf16.msra.mxu0 %v2086_v51  ;;  %v1051_v51 = vlaneseq }
 0x22b   : > { %2089 = vmatprep.subr.bf16.mxu0 %v2088_v52 }
 0x22c   : > { %v1052_v52 = vshrl.u32 %v1051_v51, 7 }
 0x22e   : > { %2091 = vmatpush1.bf16.msra.mxu0 %v2090_v57  ;;  %v1053_v53 = vsub.s32 0, %v1052_v52  ;;  %v1057_v56 = vsub.s32 1, %v1052_v52 }
 0x22f   : > { %2093 = vmatprep.subr.bf16.mxu0 %v2092_v58 }
 0x230   : > { %v1054_v58 = vrot.slane %v1049_v55, %v1053_v53  ;;  %v1058_v60 = vrot.slane %v1049_v55, %v1057_v56 }
 0x232   : > { %2095 = vmatpush1.bf16.msra.mxu0 %v2094_v61 }
 0x233   : > { %2097 = vmatprep.subr.bf16.mxu0 %v2096_v19 }
 0x236   : > { %2099 = vmatpush1.bf16.msra.mxu0 %v2098_v22 }
 0x24e   : > { %s2101_s29 = spop %2100 }
 0x24f   : > { %s1145_s12 = smul.f32 0.0009765625, %s2101_s29 }
 0x251   : > { %s1159_s28 = smul.f32 %s1145_s12, %s1145_s12  ;;  %v1161_v41 = vstv %s1145_s12 }
 0x252   : > { %v1162_v42 = vsub.f32 %v2738_v15, %v1161_v41 }
 0x2a9   : > { %v1148_v6 = vpop.xlane.xlu0 %1147 }
 0x2aa   : > { %v1149_v8 = vrot.slane %v1148_v6, 4 }
 0x2ac   : > { %v1150_v9 = vadd.f32 %v1149_v8, %v1148_v6 }
 0x2ae   : > { %v1151_v11 = vrot.slane %v1150_v9, 2 }
 0x2b0   : > { %v1152_v14 = vadd.f32 %v1151_v11, %v1150_v9 }
 0x2b2   : > { %v1153_v35 = vrot.slane %v1152_v14, 1 }
 0x2b4   : > { %v1154_v38 = vadd.f32 %v1153_v35, %v1152_v14 }
 0x2b6   : > { %2102 = vpush %v1154_v38 }
 0x2e7   : > { %s2103_s13 = spop %2102 }
 0x2e8   : > { %s1158_s27 = smul.f32 0.0009765625, %s2103_s13 }
 0x2ea   : > { %s1160_s18 = ssub.f32 %s1158_s27, %s1159_s28 }
 0x2ec   : > { %v918_v63 = vpop.f32.mrb[2].mxu0  ;;  %s1163_s19 = sadd.f32 1e-05, %s1160_s18 }
 0x2ed   : > { %v919_v0 = vadd.f32 %v1720_v62, %v918_v63  ;;  %v1936_v1 = vpop.f32.mrb[3].mxu0 }
 0x2ee   : > { %v1164_v29 = vstv %s1163_s19 }
 0x2ef   : > { %v922_v2 = vmax.f32 %v919_v0, 0.0  ;;  %2162 = vrsqrt.f32 %v1164_v29 }
 0x2f1   : > { %1970 = vmatmul.mubr.f32.vlgmr.msra.gmra.mrb[2].mxu1 %v922_v2 }
 0x2f9   : > { %v2163_v40 = vpop.eup %2162 }
 0x2fa   : > { %2104 = vpush %v2163_v40 }
 0x2fb   : > { %2106 = vpush %v1176_v37 }
 0x2fc   : > { %2108 = vpush %v1189_v39 }
 0x32b   : > { %s2105_s21 = spop %2104 }
 0x32c   : > { %v1167_v43 = vstv %s2105_s21  ;;  %s2107_s22 = spop %2106 }
 0x32d   : > { %v1168_v44 = vmul.f32 %v1167_v43, %v1162_v42  ;;  %s1180_s23 = smul.f32 0.0009765625, %s2107_s22  ;;  %s2109_s15 = spop %2108 }
 0x32e   : > { %s1193_s26 = smul.f32 0.0009765625, %s2109_s15 }
 0x32f   : > { %s1194_s29 = smul.f32 %s1180_s23, %s1180_s23  ;;  %v1196_v54 = vstv %s1180_s23 }
 0x330   : > { %v1197_v57 = vsub.f32 %v2743_v16, %v1196_v54 }
 0x331   : > { %s1195_s13 = ssub.f32 %s1193_s26, %s1194_s29 }
 0x333   : > { %s1198_s27 = sadd.f32 1e-05, %s1195_s13 }
 0x335   : > { %v1199_v45 = vstv %s1198_s27 }
 0x336   : > { %2164 = vrsqrt.f32 %v1199_v45 }
 0x340   : > { %v2165_v46 = vpop.eup %2164 }
 0x341   : > { %2110 = vpush %v2165_v46 }
 0x372   : > { %s2111_s21 = spop %2110 }
 0x373   : > { %v1202_v59 = vstv %s2111_s21 }
 0x374   : > { %v1203_v62 = vmul.f32 %v1202_v59, %v1197_v57 }
 0x3c4   : > { %v1012_v48 = vpop.f32.mrb[2].mxu1 }
 0x3c5   : > { %v1013_v15 = vadd.f32 %v1721_v47, %v1012_v48  ;;  %v1971_v49 = vpop.f32.mrb[3].mxu1 }
 0x3c7   : > { %v1016_v50 = vmax.f32 %v1013_v15, 0.0 }
 0x3c9   : > { %1126 = vmatmul.mubr.f32.vlgmr.msra.gmra.mrb[4].mxu0 %v1016_v50 }
 0x49c   : > { %v1127_v61 = vpop.f32.mrb[4].mxu0 }
 0x49d   : > { %v1128_v63 = vadd.f32 %v1127_v61, %v1054_v58  ;;  %v1129_v0 = vpop.f32.mrb[5].mxu0 }
 0x49e   : > { %v1130_v1 = vadd.f32 %v1129_v0, %v1058_v60 }
 0x49f   : > { %v1204_v2 = vmul.f32 %v1168_v44, %v1128_v63  ;;  %v1243_v3 = vmul.f32 %v1203_v62, %v1128_v63 }
 0x4a0   : > { %v1205_v4 = vmul.f32 %v1203_v62, %v1130_v1  ;;  %v1242_v5 = vmul.f32 %v1168_v44, %v1130_v1 }
 0x4a2   : > { %v1206_v6 = vsub.f32 %v1204_v2, %v1205_v4  ;;  %v2858_v7 = vadd.f32 %v1243_v3, %v1242_v5 }
 0x4a4   : > { %1207 = vadd.xlane.f32.xlu0 %v1206_v6  ;;  %v1219_v8 = vmul.f32 %v1206_v6, %v1206_v6  ;;  %v1257_v16 = vmul.f32 %v2858_v7, %v2858_v7 }
 0x4a6   : > { %1220 = vadd.xlane.f32.xlu1 %v1219_v8 }
 0x4a8   : > { %1245 = vadd.xlane.f32.xlu0 %v2858_v7 }
 0x4aa   : > { %1258 = vadd.xlane.f32.xlu1 %v1257_v16 }
 0x531   : > { %v1208_v9 = vpop.xlane.xlu0 %1207 }
 0x532   : > { %v1209_v10 = vrot.slane %v1208_v9, 4 }
 0x533   : > { %v1221_v11 = vpop.xlane.xlu1 %1220 }
 0x534   : > { %v1210_v12 = vadd.f32 %v1209_v10, %v1208_v9  ;;  %v1222_v13 = vrot.slane %v1221_v11, 4 }
 0x535   : > { %v1246_v23 = vpop.xlane.xlu0 %1245 }
 0x536   : > { %v1211_v14 = vrot.slane %v1210_v12, 2  ;;  %v1223_v35 = vadd.f32 %v1222_v13, %v1221_v11  ;;  %v1247_v25 = vrot.slane %v1246_v23, 4 }
 0x537   : > { %v1259_v24 = vpop.xlane.xlu1 %1258 }
 0x538   : > { %v1224_v38 = vrot.slane %v1223_v35, 2  ;;  %v1212_v17 = vadd.f32 %v1211_v14, %v1210_v12  ;;  %v1260_v26 = vrot.slane %v1259_v24, 4  ;;  %v1248_v27 = vadd.f32 %v1247_v25, %v1246_v23 }
 0x53a   : > { %v1213_v18 = vrot.slane %v1212_v17, 1  ;;  %v1225_v19 = vadd.f32 %v1224_v38, %v1223_v35  ;;  %v1261_v28 = vadd.f32 %v1260_v26, %v1259_v24  ;;  %v1249_v29 = vrot.slane %v1248_v27, 2 }
 0x53c   : > { %v1214_v20 = vadd.f32 %v1213_v18, %v1212_v17  ;;  %v1226_v21 = vrot.slane %v1225_v19, 1  ;;  %v1262_v30 = vrot.slane %v1261_v28, 2  ;;  %v1250_v32 = vadd.f32 %v1249_v29, %v1248_v27 }
 0x53e   : > { %2112 = vpush %v1214_v20  ;;  %v1227_v22 = vadd.f32 %v1226_v21, %v1225_v19  ;;  %v1263_v33 = vadd.f32 %v1262_v30, %v1261_v28  ;;  %v1251_v34 = vrot.slane %v1250_v32, 1 }
 0x540   : > { %2114 = vpush %v1227_v22  ;;  %v1264_v36 = vrot.slane %v1263_v33, 1  ;;  %v1252_v39 = vadd.f32 %v1251_v34, %v1250_v32 }
 0x542   : > { %v1265_v40 = vadd.f32 %v1264_v36, %v1263_v33 }
 0x56f   : > { %s2113_s22 = spop %2112 }
 0x570   : > { %s1218_s23 = smul.f32 0.0009765625, %s2113_s22 }
 0x571   : > { %s2115_s15 = spop %2114 }
 0x572   : > { %s1232_s26 = smul.f32 %s1218_s23, %s1218_s23  ;;  %v1234_v41 = vstv %s1218_s23 }
 0x573   : > { %s1231_s29 = smul.f32 0.0009765625, %s2115_s15  ;;  %v1235_v42 = vsub.f32 %v1206_v6, %v1234_v41 }
 0x575   : > { %s1233_s13 = ssub.f32 %s1231_s29, %s1232_s26 }
 0x577   : > { %s1236_s27 = sadd.f32 1e-05, %s1233_s13 }
 0x579   : > { %v1237_v31 = vstv %s1236_s27 }
 0x57a   : > { %2166 = vrsqrt.f32 %v1237_v31 }
 0x584   : > { %v2167_v37 = vpop.eup %2166 }
 0x585   : > { %2116 = vpush %v2167_v37 }
 0x586   : > { %2118 = vpush %v1252_v39 }
 0x587   : > { %2120 = vpush %v1265_v40 }
 0x5b6   : > { %s2117_s28 = spop %2116 }
 0x5b7   : > { %v1240_v43 = vstv %s2117_s28  ;;  %s2119_s18 = spop %2118 }
 0x5b8   : > { %v1241_v44 = vmul.f32 %v1240_v43, %v1235_v42  ;;  %s1256_s12 = smul.f32 0.0009765625, %s2119_s18  ;;  %s2121_s19 = spop %2120 }
 0x5b9   : > { %s1269_s21 = smul.f32 0.0009765625, %s2121_s19 }
 0x5ba   : > { %s1270_s22 = smul.f32 %s1256_s12, %s1256_s12  ;;  %v1272_v47 = vstv %s1256_s12 }
 0x5bb   : > { %v1273_v48 = vsub.f32 %v2858_v7, %v1272_v47 }
 0x5bc   : > { %s1271_s15 = ssub.f32 %s1269_s21, %s1270_s22 }
 0x5be   : > { %s1274_s26 = sadd.f32 1e-05, %s1271_s15 }
 0x5c0   : > { %v1275_v45 = vstv %s1274_s26 }
 0x5c1   : > { %2168 = vrsqrt.f32 %v1275_v45 }
 0x5cb   : > { %v2169_v46 = vpop.eup %2168 }
 0x5cc   : > { %2122 = vpush %v2169_v46 }
 0x5fd   : > { %s2123_s29 = spop %2122 }
 0x5fe   : > { %v1278_v15 = vstv %s2123_s29 }
 0x5ff   : > { %v1279_v49 = vmul.f32 %v1278_v15, %v1273_v48 }
 0x601   : > { %v1763_v50 = vpack.c.bf16 %v1279_v49, %v1241_v44 }
 0x603   : > { %1288 = vst [vmem:[#allocation2] sm:$0xff] %v1763_v50 }
 0x604 PF: > { %v2171_v51 = vld [vmem:[%s2485_s25 + $0x4] ss:$8 sps:$4 sm:$0xff]   ;;  %v2173_v52 = vld [vmem:[%s2485_s25] ss:$8 sps:$4 sm:$0xff]   ;;  %v2174_v53 = vld [vmem:[%s2485_s25 + $0x14] ss:$8 sps:$4 sm:$0xff]  }
 0x605   : > { %1496 = vmatprep.subr.bf16.mxu0 %v2171_v51  ;;  %v2176_v54 = vld [vmem:[%s2485_s25 + $0x10] ss:$8 sps:$4 sm:$0xff]   ;;  %v2177_v55 = vld [vmem:[%s2485_s25 + $0x24] ss:$8 sps:$4 sm:$0xff]   ;;  %v2179_v56 = vld [vmem:[%s2485_s25 + $0x20] ss:$8 sps:$4 sm:$0xff]  }
 0x606   : > { %1497 = vmatpush1.bf16.msra.mxu0 %v2173_v52  ;;  %v2180_v57 = vld [vmem:[%s2485_s25 + $0x34] ss:$8 sps:$4 sm:$0xff]   ;;  %v2182_v58 = vld [vmem:[%s2485_s25 + $0x30] ss:$8 sps:$4 sm:$0xff]   ;;  %v2183_v59 = vld [vmem:[%s2485_s25 + $0x44] ss:$8 sps:$4 sm:$0xff]  }
 0x607   : > { %1498 = vmatprep.subr.bf16.mxu0 %v2174_v53  ;;  %v2185_v60 = vld [vmem:[%s2485_s25 + $0x40] ss:$8 sps:$4 sm:$0xff]   ;;  %v2186_v61 = vld [vmem:[%s2485_s25 + $0x54] ss:$8 sps:$4 sm:$0xff]   ;;  %v2188_v62 = vld [vmem:[%s2485_s25 + $0x50] ss:$8 sps:$4 sm:$0xff]  }
 0x608   : > { %v2189_v63 = vld [vmem:[%s2485_s25 + $0x64] ss:$8 sps:$4 sm:$0xff]   ;;  %v2191_v2 = vld [vmem:[%s2485_s25 + $0x60] ss:$8 sps:$4 sm:$0xff]   ;;  %v2192_v3 = vld [vmem:[%s2485_s25 + $0x74] ss:$8 sps:$4 sm:$0xff]  }
 0x609   : > { %v2194_v4 = vld [vmem:[%s2485_s25 + $0x70] ss:$8 sps:$4 sm:$0xff]   ;;  %v2195_v5 = vld [vmem:[%s2485_s25 + $0x84] ss:$8 sps:$4 sm:$0xff]   ;;  %v2197_v6 = vld [vmem:[%s2485_s25 + $0x80] ss:$8 sps:$4 sm:$0xff]  }
 0x60a   : > { %1499 = vmatpush1.bf16.msra.mxu0 %v2176_v54  ;;  %v1296_v0 = vld [vmem:[#allocation2] sm:$0xff]  ;;  %v2198_v7 = vld [vmem:[%s2485_s25 + $0x94] ss:$8 sps:$4 sm:$0xff]   ;;  %v2200_v8 = vld [vmem:[%s2485_s25 + $0x90] ss:$8 sps:$4 sm:$0xff]   ;;  %v2295_v31 = vmov 0  }
 0x60b   : > { %1500 = vmatprep.subr.bf16.mxu0 %v2177_v55  ;;  %v1724_v1 = vcombine.high %v1296_v0, %v1296_v0  ;;  %v2201_v16 = vld [vmem:[%s2485_s25 + $0xa4] ss:$8 sps:$4 sm:$0xff]   ;;  %v2203_v9 = vld [vmem:[%s2485_s25 + $0xa0] ss:$8 sps:$4 sm:$0xff]   ;;  %v2204_v10 = vld [vmem:[%s2485_s25 + $0xb4] ss:$8 sps:$4 sm:$0xff]   ;;  %v1723_v20 = vcombine.low %v1296_v0, %v1296_v0  ;;  %2170 = vset.pattern.permute.xlu0 %v2295_v31 }
 0x60c   : > { %v2206_v11 = vld [vmem:[%s2485_s25 + $0xb0] ss:$8 sps:$4 sm:$0xff]   ;;  %v2207_v12 = vld [vmem:[%s2485_s25 + $0xc4] ss:$8 sps:$4 sm:$0xff]   ;;  %v2209_v13 = vld [vmem:[%s2485_s25 + $0xc0] ss:$8 sps:$4 sm:$0xff]  }
 0x60d   : > { %1528 = vmatprep.mubr.bf16.mxu0 %v1724_v1  ;;  %v2210_v14 = vld [vmem:[%s2485_s25 + $0xd4] ss:$8 sps:$4 sm:$0xff]   ;;  %v2212_v35 = vld [vmem:[%s2485_s25 + $0xd0] ss:$8 sps:$4 sm:$0xff]   ;;  %v2213_v38 = vld [vmem:[%s2485_s25 + $0xe4] ss:$8 sps:$4 sm:$0xff]  }
 0x60e   : > { %1501 = vmatpush1.bf16.msra.mxu0 %v2179_v56  ;;  %v2215_v17 = vld [vmem:[%s2485_s25 + $0xe0] ss:$8 sps:$4 sm:$0xff]   ;;  %v2216_v18 = vld [vmem:[%s2485_s25 + $0xf4] ss:$8 sps:$4 sm:$0xff]   ;;  %v2218_v19 = vld [vmem:[%s2485_s25 + $0xf0] ss:$8 sps:$4 sm:$0xff]  }
 0x60f   : > { %1502 = vmatprep.subr.bf16.mxu0 %v2180_v57  ;;  %v1537_v21 = vld [vmem:[%s2483_s24] sm:$0xff]  ;;  %v1538_v22 = vld [vmem:[%s2483_s24 + $0x8] sm:$0xff]  ;;  %vm1564_vm4 = vcmask 7168   ;;  %p1757_p10 = scmp.ne.s32.totalorder %s2388_s16, 3 }
 0x610   : > { %vm1581_vm2 = vcmp.gt.f32.partialorder %v1537_v21, 0.0  ;;  %vm1582_vm3 = vcmp.gt.f32.partialorder %v1538_v22, 0.0  ;;  %v1539_v32 = vld [vmem:[#allocation3] sm:$0xff]  ;;  %v1568_v40 = vadd.f32 %v1538_v22, %v1537_v21  ;;  %v1574_v41 = vand.u32 2147483647, %v1537_v21 }
 0x611   : > { %v1583_v33 = vsel %vm1581_vm2, %v1537_v21, 1.0  ;;  %v1584_v34 = vsel %vm1582_vm3, %v1538_v22, 1.0  ;;  %v1575_v42 = vand.u32 2147483647, %v1538_v22  ;;  %vm1641_vm5 = vcmask (!%p1757_p10), 0  }
 0x612   : > { %1503 = vmatpush1.bf16.msra.mxu0 %v2182_v58  ;;  %2221 = vlog2.f32 %v1583_v33  ;;  %1569 = vadd.xlane.f32.xlu1 %v1568_v40 }
 0x613   : > { %1504 = vmatprep.subr.bf16.mxu0 %v2183_v59  ;;  %2223 = vlog2.f32 %v1584_v34  ;;  %v1576_v45 = vadd.f32 %v1575_v42, %v1574_v41 }
 0x616   : > { %1505 = vmatpush1.bf16.msra.mxu0 %v2185_v60  ;;  %1577 = vadd.xlane.f32.xlu1 %v1576_v45  ;;  %v1567_v60 = vld [vmem:[#allocation5] sm:$0xff] }
 0x617   : > { %1506 = vmatprep.subr.bf16.mxu0 %v2186_v61 }
 0x61a   : > { %1507 = vmatpush1.bf16.msra.mxu0 %v2188_v62 }
 0x61b   : > { %1508 = vmatprep.subr.bf16.mxu0 %v2189_v63  ;;  %v1573_v63 = vld [vmem:[#allocation6] sm:$0xff] }
 0x61c   : > { %v2222_v43 = vpop.eup %2221 }
 0x61d   : > { %v2224_v44 = vpop.eup %2223  ;;  %v1587_v46 = vmul.f32 0.6931472, %v2222_v43 }
 0x61e   : > { %1509 = vmatpush1.bf16.msra.mxu0 %v2191_v2  ;;  %v1589_v47 = vmul.f32 0.6931472, %v2224_v44  ;;  %v1585_v2 = vld [vmem:[#allocation7] sm:$0xff] }
 0x61f   : > { %1510 = vmatprep.subr.bf16.mxu0 %v2192_v3  ;;  %v1590_v48 = vmul.f32 %v1587_v46, %v1537_v21 }
 0x620   : > { %v1591_v15 = vmul.f32 %v1589_v47, %v1538_v22 }
 0x621   : > { %v1592_v49 = vsel %vm1581_vm2, %v1590_v48, 0.0 }
 0x622   : > { %1511 = vmatpush1.bf16.msra.mxu0 %v2194_v4  ;;  %v1593_v50 = vsel %vm1582_vm3, %v1591_v15, 0.0 }
 0x623   : > { %1512 = vmatprep.subr.bf16.mxu0 %v2195_v5  ;;  %v1594_v51 = vadd.f32 %v1593_v50, %v1592_v49 }
 0x625   : > { %1595 = vadd.xlane.f32.xlu1 %v1594_v51 }
 0x626   : > { %1513 = vmatpush1.bf16.msra.mxu0 %v2197_v6 }
 0x627   : > { %1514 = vmatprep.subr.bf16.mxu0 %v2198_v7  ;;  %v1547_v7 = vld [vmem:[#allocation4] sm:$0xff] }
 0x62a   : > { %1515 = vmatpush1.bf16.msra.mxu0 %v2200_v8 }
 0x62b   : > { %1516 = vmatprep.subr.bf16.mxu0 %v2201_v16 }
 0x62e   : > { %1517 = vmatpush1.bf16.msra.mxu0 %v2203_v9 }
 0x62f   : > { %1518 = vmatprep.subr.bf16.mxu0 %v2204_v10  ;;  %v1599_v10 = vld [vmem:[#allocation8] sm:$0xff] }
 0x632   : > { %1519 = vmatpush1.bf16.msra.mxu0 %v2206_v11 }
 0x633   : > { %1520 = vmatprep.subr.bf16.mxu0 %v2207_v12 }
 0x636   : > { %1521 = vmatpush1.bf16.msra.mxu0 %v2209_v13 }
 0x637   : > { %1522 = vmatprep.subr.bf16.mxu0 %v2210_v14 }
 0x63a   : > { %1523 = vmatpush1.bf16.msra.mxu0 %v2212_v35 }
 0x63b   : > { %1524 = vmatprep.subr.bf16.mxu0 %v2213_v38 }
 0x63e   : > { %1525 = vmatpush1.bf16.msra.mxu0 %v2215_v17 }
 0x63f   : > { %1526 = vmatprep.subr.bf16.mxu0 %v2216_v18 }
 0x642   : > { %1527 = vmatpush1.bf16.msra.mxu0 %v2218_v19 }
 0x645   : > { %1529 = vmatmul.mubr.bf16.vlgmr.msra.gmra.mrb[0].mxu0 %v1723_v20 }
 0x69f   : > { %v1570_v61 = vpop.xlane.xlu1 %1569 }
 0x6a0   : > { %v1571_v62 = vadd.f32 %v1570_v61, %v1567_v60 }
 0x6a2   : > { %1572 = vst.msk [vmem:[#allocation5] sm:$0xff] %vm1564_vm4, %v1571_v62 }
 0x6a3   : > { %v1578_v0 = vpop.xlane.xlu1 %1577 }
 0x6a4   : > { %v1579_v1 = vadd.f32 %v1578_v0, %v1573_v63 }
 0x6a6   : > { %1580 = vst.msk [vmem:[#allocation6] sm:$0xff] %vm1564_vm4, %v1579_v1 }
 0x6a9   : > { %v1619_v20 = vld [vmem:[#allocation5] sm:$0xff] (!%p1757_p10) }
 0x6ad   : > { %v1611_v13 = vld [vmem:[#allocation6] sm:$0xff] (!%p1757_p10) }
 0x6ae   : > { %v1612_v35 = vmax.f32 (!%p1757_p10), %v1611_v13, 1e-12 }
 0x6b2   : > { %v1596_v3 = vpop.xlane.xlu1 %1595 }
 0x6b3   : > { %v1597_v4 = vadd.f32 %v1596_v3, %v1585_v2 }
 0x6b5   : > { %1598 = vst.msk [vmem:[#allocation7] sm:$0xff] %vm1564_vm4, %v1597_v4 }
 0x718   : > { %v1530_v23 = vpop.f32.mrb[0].mxu0 }
 0x719   : > { %v1532_v24 = vpop.f32.mrb[1].mxu0  ;;  %v1600_v25 = vmul.f32 %v1537_v21, %v1530_v23 }
 0x71a   : > { %v1534_v26 = vpop.f32.mrb[2].mxu0  ;;  %v1540_v27 = vmax.f32 %v1530_v23, %v1532_v24  ;;  %v1601_v28 = vmul.f32 %v1538_v22, %v1532_v24 }
 0x71b   : > { %v1535_v29 = vpop.f32.mrb[3].mxu0 }
 0x71c   : > { %1541 = vmax.xlane.f32.xlu0 %v1540_v27  ;;  %v1602_v30 = vadd.f32 %v1601_v28, %v1600_v25 }
 0x7a9   : > { %v1542_v36 = vpop.xlane.xlu0 %1541 }
 0x7aa   : > { %v1543_v37 = vmax.f32 %v1539_v32, %v1542_v36 }
 0x7ac   : > { %v1544_v39 = vsub.f32 %v1539_v32, %v1543_v37  ;;  %1566 = vst.msk [vmem:[#allocation3] sm:$0xff] %vm1564_vm4, %v1543_v37  ;;  %1551 = vperm.xlu0 %2170, %v1543_v37  }
 0x7ae   : > { %v1545_v5 = vmul.f32 1.442695, %v1544_v39 }
 0x7b3   : > { %v1613_v17 = vld [vmem:[#allocation3] sm:$0xff] (!%p1757_p10) }
 0x82b   : > { %v1552_v52 = vpop.permute.xlu0 %1551 }
 0x82c   : > { %v1554_v53 = vsub.f32 %v1530_v23, %v1552_v52  ;;  %v1555_v54 = vsub.f32 %v1532_v24, %v1552_v52  ;;  %v1618_v23 = vld [vmem:[#allocation7] sm:$0xff] (!%p1757_p10) }
 0x82e   : > { %v1556_v55 = vmul.f32 1.442695, %v1554_v53  ;;  %v1558_v56 = vmul.f32 1.442695, %v1555_v54 }
 0x830   : > { %2225 = vpow2.f32 %v1556_v55 }
 0x831   : > { %2227 = vpow2.f32 %v1558_v56 }
 0x832   : > { %2229 = vpow2.f32 %v1545_v5 }
 0x83a   : > { %v2226_v57 = vpop.eup %2225 }
 0x83b   : > { %v2228_v58 = vpop.eup %2227 }
 0x83c   : > { %v1560_v59 = vadd.f32 %v2228_v58, %v2226_v57  ;;  %v2230_v6 = vpop.eup %2229 }
 0x83d   : > { %v1548_v8 = vmul.f32 %v2230_v6, %v1547_v7 }
 0x83e   : > { %1561 = vadd.xlane.f32.xlu1 %v1560_v59 }
 0x842   : > { %1603 = vadd.xlane.f32.xlu1 %v1602_v30 }
 0x8cb   : > { %v1562_v16 = vpop.xlane.xlu1 %1561 }
 0x8cc   : > { %v1563_v9 = vadd.f32 %v1562_v16, %v1548_v8  ;;  %1610 = sbr.rel (%p1757_p10) target bundleno = 2493 (0x9bd), region = 122 }
 0x8ce   : > { %1565 = vst.msk [vmem:[#allocation4] sm:$0xff] %vm1564_vm4, %v1563_v9 }
 0x8cf   : > { %v1604_v11 = vpop.xlane.xlu1 %1603 }
 0x8d0   : > { %v1605_v12 = vadd.f32 %v1604_v11, %v1599_v10 }
 0x8d2   : > { %1606 = vst.msk [vmem:[#allocation8] sm:$0xff] %vm1564_vm4, %v1605_v12 }
 0x8d5   : > { %v1614_v14 = vld [vmem:[#allocation4] sm:$0xff] }
 0x8d6   : > { %2231 = vlog2.f32 %v1614_v14 }
 0x8d7   : > { %2233 = vlog2.f32 %v1612_v35 }
 0x8d8   : > { %2235 = vrcp.f32 %v1612_v35 }
 0x8d9   : > { %v1624_v25 = vld [vmem:[#allocation8] sm:$0xff] }
 0x8e0   : > { %v2232_v38 = vpop.eup %2231 }
 0x8e1   : > { %v1616_v18 = vmul.f32 0.6931472, %v2232_v38  ;;  %v2234_v19 = vpop.eup %2233 }
 0x8e2   : > { %v1621_v22 = vmul.f32 0.6931472, %v2234_v19  ;;  %v2236_v29 = vpop.eup %2235 }
 0x8e3   : > { %v1617_v21 = vadd.f32 %v1616_v18, %v1613_v17 }
 0x8e4   : > { %v1622_v24 = vmul.f32 %v1621_v22, %v1619_v20 }
 0x8e5   : > { %v1626_v27 = vmul.f32 %v1619_v20, %v1617_v21 }
 0x8e6   : > { %v1623_v26 = vsub.f32 %v1618_v23, %v1622_v24 }
 0x8e8   : > { %v1625_v28 = vsub.f32 %v1623_v26, %v1624_v25 }
 0x8ea   : > { %v1627_v30 = vadd.f32 %v1626_v27, %v1625_v28 }
 0x8ec   : > { %v1629_v31 = vmul.f32 %v2236_v29, %v1627_v30 }
 0x8ee   : > { %v1630_v32 = vsel %vm1564_vm4, %v1629_v31, 0.0 }
 0x8ef   : > { %1631 = vadd.xlane.f32.xlu0 %v1630_v32 }
 0x97c   : > { %v1632_v33 = vpop.xlane.xlu0 %1631 }
 0x97d   : > { %v1633_v34 = vrot.slane %v1632_v33, 4 }
 0x97f   : > { %v1634_v36 = vadd.f32 %v1633_v34, %v1632_v33 }
 0x981   : > { %v1635_v37 = vrot.slane %v1634_v36, 2 }
 0x983   : > { %v1636_v39 = vadd.f32 %v1635_v37, %v1634_v36 }
 0x985   : > { %v1637_v40 = vrot.slane %v1636_v39, 1 }
 0x987   : > { %v1638_v41 = vadd.f32 %v1637_v40, %v1636_v39 }
 0x989   : > { %2124 = vpush %v1638_v41 }
 0x9ba   : > { %s2125_s24 = spop %2124 }
 0x9bb   : > { %v1640_v42 = vstv %s2125_s24 }
 0x9bc   : > { %1642 = vst.msk [vmem:[#allocation10] sm:$0x1] %vm1641_vm5, %v1640_v42 }
 0x9bd PF: > { %p2130_p11 = scmp.eq.s32.totalorder %s2388_s16, 3  ;;  %s2296_s25 = smov [#allocation10]  }
 0x9be   : > { %s1650_s23 = sshll.u32 %s2296_s25, 4  ;;  %s1651_s23 = int_to_ptr.vmem [resolvable:$true] %s1650_s23 }
 0x9bf   : > { %s2237_s13 = scalar_lea.vmem %s1651_s23, 16  ;;  %s2243_s27 = scalar_lea.vmem %s1651_s23, 32 }
 0x9c0   : > { %p2238_p12 = scmp.ne.s32.totalorder %s1651_s23, %s2237_s13  ;;  %p2244_p1 = scmp.lt.s32.totalorder %s1651_s23, %s1651_s23 }
 0x9c1   : > { %p2245_p2 = scmp.lt.s32.totalorder %s2243_s27, %s2237_s13 }
 0x9c2   : > { %p2239_p13 = pnand %p2238_p12, %p2130_p11 }
 0x9c3   : > { %p2246_p3 = por %p2245_p2, %p2244_p1 }
 0x9c4   : > { %p2240_p0 = pneg %p2239_p13 }
 0x9c6   : > { %p2247_p4 = pnand %p2246_p3, %p2240_p0 }
 0x9c8   : > { %2250 = shalt.err (!%p2247_p4)
}
 0x9c9   : > { %s2251_s12 = scalar_lea.hbm %s2957_s14, 16 }
 0x9ca   : > { %p2252_p5 = scmp.ne.s32.totalorder %s2957_s14, %s2251_s12  ;;  %p2257_p8 = scmp.lt.u32.totalorder %s2251_s12, %s2957_s14 }
 0x9cc   : > { %p2253_p6 = pnand %p2252_p5, %p2130_p11 }
 0x9ce   : > { %p2254_p7 = pneg %p2253_p6 }
 0x9d0   : > { %p2259_p9 = pnand %p2257_p8, %p2254_p7 }
 0x9d2   : > { %2262 = shalt.err (!%p2259_p9)
}
 0x9d3   : > { %2127 = dma.vmem_to_hbm [thread:$0]  (%p2130_p11), %s1651_s23, 16, %s2957_s14, [#allocation11]  }
 0x9d4   : > { %2276 = dma.done.wait (%p2130_p11), [#allocation11], 16  }
 0x9d5   : > { %2278 = vsyncadd (%p2130_p11), [#allocation11], 4294967280 }
 0x9d6 PF: > { %p22_p10 = scmp.ge.s32.totalorder %s2391_s17, 6   ;;  %s2962_s29 = smov %s2285_s30 }
 0x9d7   : > { %s2963_s30 = smov %s2400_s20  ;;  %s2964_s15 = smov %s2391_s17 }
 0x9d8   :  { %24 = sbr.rel (!%p22_p10) target bundleno = 5 (0x5), region = 157 }
 0x9df   :  { %1663 = vsyncpa [#allocation11], 1 }
 0x9e0   :  { %1665 = vsyncpa [#allocation11 + $0x1], 1 }

</bundles_post_ra>
